<compile_context>
chip_gen: v5e
topology: v5e:2x2
jax: 0.10.0
libtpu: 0.0.40
codegen_flags: <defaults>
</compile_context>

<pallas_src>
import math
from functools import partial

import jax
import jax.numpy as jnp
from jax.experimental import pallas as pl
from jax.experimental.pallas import tpu as pltpu


def _round_up(a, m):
    return ((a + m - 1) // m) * m


def _leaky_relu(x, negative_slope=0.2):
    return jnp.where(x > 0, x, negative_slope * x)


def decoder_kernel(x_ref, w1_ref, b1_ref, w2_ref, b2_ref, w3_ref, b3_ref, o_ref):
    # fc1 (bf16 x bf16 -> f32 accum on MXU) + bias + LeakyReLU in f32
    h = jnp.dot(x_ref[...], w1_ref[...], preferred_element_type=jnp.float32)
    h = _leaky_relu(h + b1_ref[...])
    # fc2
    h = jnp.dot(h.astype(jnp.bfloat16), w2_ref[...],
                preferred_element_type=jnp.float32)
    h = _leaky_relu(h + b2_ref[...])
    # output fc (no activation)
    out = jnp.dot(h.astype(jnp.bfloat16), w3_ref[...],
                  preferred_element_type=jnp.float32) + b3_ref[...]
    o_ref[...] = out.astype(o_ref.dtype)


def prepare_decoder_params(params):
    """One-time weight prep: pad z-dim (K of layer 1) to 128 and cast matmul
    operands to bf16; biases stay f32 (epilogue runs in f32). Call once at init
    (or after each weight update) and reuse the result for every forward."""
    w1, b1 = params["w1"], params["b1"]
    w2, b2 = params["w2"], params["b2"]
    w3, b3 = params["w3"], params["b3"]
    Z, H2 = w1.shape
    ZP = _round_up(Z, 128)                      # e.g. 20 -> 128
    w1_p = jnp.zeros((ZP, H2), jnp.bfloat16).at[:Z, :].set(w1.astype(jnp.bfloat16))
    return {
        "w1": w1_p,
        "b1": b1.astype(jnp.float32).reshape(1, -1),
        "w2": w2.astype(jnp.bfloat16),
        "b2": b2.astype(jnp.float32).reshape(1, -1),
        "w3": w3.astype(jnp.bfloat16),
        "b3": b3.astype(jnp.float32).reshape(1, -1),
    }


@partial(jax.jit, static_argnames=("out_dtype",))
def decoder_forward(x, prep, out_dtype=jnp.float32):
    """x: (B, z_dim) float32. prep: output of prepare_decoder_params.
    Returns (B, x_dim) in out_dtype (default float32)."""
    w1, b1 = prep["w1"], prep["b1"]
    w2, b2 = prep["w2"], prep["b2"]
    w3, b3 = prep["w3"], prep["b3"]

    B, Z = x.shape
    ZP, H2 = w1.shape
    H1 = w2.shape[1]
    X = w3.shape[1]

    # Batch tiling: large tiles to amortize per-grid-step overhead; at least
    # two grid steps for large B so the "parallel" axis spans both v7x TCs.
    if B <= 256:
        nb = 1
        TB = max(8, _round_up(B, 8))
    else:
        nb = max(2, -(-B // 512))               # ceil(B / 512), >= 2 steps
        TB = _round_up(-(-B // nb), 8)
    BP = nb * TB

    # Pad x once (batch to BP, z to ZP) and cast to bf16; fuses under jit.
    x_p = jnp.zeros((BP, ZP), jnp.bfloat16).at[:B, :Z].set(x.astype(jnp.bfloat16))

    # Weights/biases: constant block index -> DMA'd once, resident across tiles.
    const = lambda shp: pl.BlockSpec(shp, lambda b: (0,) * len(shp))

    out = pl.pallas_call(
        decoder_kernel,
        out_shape=jax.ShapeDtypeStruct((BP, X), out_dtype),
        grid=(nb,),
        in_specs=[
            pl.BlockSpec((TB, ZP), lambda b: (b, 0)),   # x: tiled over batch
            const(w1.shape), const(b1.shape),
            const(w2.shape), const(b2.shape),
            const(w3.shape), const(b3.shape),
        ],
        # Last output dim equals the full array dim (784) -> legal block,
        # unpadded lane-width; no post-kernel column slice needed.
        out_specs=pl.BlockSpec((TB, X), lambda b: (b, 0)),
        compiler_params=pltpu.CompilerParams(
            dimension_semantics=("parallel",),
            vmem_limit_bytes=32 << 20,
        ),
    )(x_p, w1, b1, w2, b2, w3, b3)

    return out if BP == B else out[:B]


def init_decoder_params(key, z_dim=20, hidden_dim2=256, hidden_dim1=512, x_dim=784):
    """Deterministic PyTorch-Linear-style init (kaiming-uniform-ish), stored as
    (in_features, out_features) for the kernel."""
    def linear_init(k, fan_in, fan_out):
        kw, kb = jax.random.split(k)
        bound = 1.0 / math.sqrt(fan_in)
        w = jax.random.uniform(kw, (fan_in, fan_out), jnp.float32, -bound, bound)
        b = jax.random.uniform(kb, (1, fan_out), jnp.float32, -bound, bound)
        return w, b

    k1, k2, k3 = jax.random.split(key, 3)
    w1, b1 = linear_init(k1, z_dim, hidden_dim2)
    w2, b2 = linear_init(k2, hidden_dim2, hidden_dim1)
    w3, b3 = linear_init(k3, hidden_dim1, x_dim)
    return {"w1": w1, "b1": b1, "w2": w2, "b2": b2, "w3": w3, "b3": b3}


def decoder_reference_f32(x, params):
    """Pure-JAX full-f32 reference (module semantics)."""
    h = _leaky_relu(x @ params["w1"] + params["b1"])
    h = _leaky_relu(h @ params["w2"] + params["b2"])
    return h @ params["w3"] + params["b3"]


def decoder_reference_bf16(x, params):
    """Pure-JAX reference that mimics the kernel's bf16-input / f32-accum math."""
    bf = lambda a: a.astype(jnp.bfloat16).astype(jnp.float32)
    h = _leaky_relu(bf(x) @ bf(params["w1"]) + params["b1"])
    h = _leaky_relu(bf(h) @ bf(params["w2"]) + params["b2"])
    return bf(h) @ bf(params["w3"]) + params["b3"]


if __name__ == "__main__":
    key = jax.random.PRNGKey(0)
    k_params, k_x1, k_x2 = jax.random.split(key, 3)

    # Config: z_dim=20, hidden_dim2=256, hidden_dim1=512, x_dim=784.
    Z, X = 20, 784
    params = init_decoder_params(k_params, z_dim=Z, hidden_dim2=256,
                                 hidden_dim1=512, x_dim=X)
    prep = prepare_decoder_params(params)   # one-time weight prep

    def check(x):
        out = jax.block_until_ready(decoder_forward(x, prep))
        assert out.shape == (x.shape[0], X), out.shape
        # Tight check vs. a reference using the same bf16 matmul-input precision.
        ref_bf16 = decoder_reference_bf16(x, params)
        assert jnp.allclose(out, ref_bf16, atol=1e-2, rtol=1e-2), \
            "mismatch vs bf16-precision reference"
        # Loose check vs. the full-f32 module semantics.
        ref_f32 = decoder_reference_f32(x, params)
        assert jnp.allclose(out, ref_f32, atol=1e-1, rtol=1e-1), \
            "mismatch vs f32 reference"

    # Small batch (single grid step).
    check(jax.random.normal(k_x1, (8, Z), dtype=jnp.float32))
    # Larger batch (multi grid step + batch padding path).
    check(jax.random.normal(k_x2, (300, Z), dtype=jnp.float32))

    print("KERNEL_OK")
</pallas_src>

<mosaic_0001>
module attributes {stable_mosaic.version = 11 : i64} {
  func.func @decoder_kernel(%arg0: i32, %arg1: memref<8x128xbf16, #tpu.memory_space<vmem>>, %arg2: memref<128x256xbf16, #tpu.memory_space<vmem>>, %arg3: memref<1x256xf32, #tpu.memory_space<vmem>>, %arg4: memref<256x512xbf16, #tpu.memory_space<vmem>>, %arg5: memref<1x512xf32, #tpu.memory_space<vmem>>, %arg6: memref<512x784xbf16, #tpu.memory_space<vmem>>, %arg7: memref<1x784xf32, #tpu.memory_space<vmem>>, %arg8: memref<8x784xf32, #tpu.memory_space<vmem>>) attributes {dimension_semantics = [#tpu.dimension_semantics<parallel>], iteration_bounds = array<i64: 1>, scalar_prefetch = 0 : i64, scratch_operands = 0 : i64, tpu.core_type = #tpu.core_type<tc>, window_params = [{transform_indices = @transform_0, window_bounds = array<i64: 8, 128>}, {pipeline_mode = #tpu.pipeline_mode<synchronous>, transform_indices = @transform_1, window_bounds = array<i64: 128, 256>}, {pipeline_mode = #tpu.pipeline_mode<synchronous>, transform_indices = @transform_2, window_bounds = array<i64: 1, 256>}, {pipeline_mode = #tpu.pipeline_mode<synchronous>, transform_indices = @transform_3, window_bounds = array<i64: 256, 512>}, {pipeline_mode = #tpu.pipeline_mode<synchronous>, transform_indices = @transform_4, window_bounds = array<i64: 1, 512>}, {pipeline_mode = #tpu.pipeline_mode<synchronous>, transform_indices = @transform_5, window_bounds = array<i64: 512, 784>}, {pipeline_mode = #tpu.pipeline_mode<synchronous>, transform_indices = @transform_6, window_bounds = array<i64: 1, 784>}, {transform_indices = @transform_7, window_bounds = array<i64: 8, 784>}]} {
    %c0 = arith.constant 0 : index
    %c0_0 = arith.constant 0 : index
    %0 = vector.load %arg1[%c0, %c0_0] : memref<8x128xbf16, #tpu.memory_space<vmem>>, vector<8x128xbf16>
    %c0_1 = arith.constant 0 : index
    %c0_2 = arith.constant 0 : index
    %1 = vector.load %arg2[%c0_1, %c0_2] : memref<128x256xbf16, #tpu.memory_space<vmem>>, vector<128x256xbf16>
    %cst = arith.constant dense<0.000000e+00> : vector<8x256xf32>
    %2 = tpu.matmul %0, %1, %cst {dimension_numbers = #tpu.dot_dimension_numbers<[1], [0], [0], [1], [0, 0, 1, 1], [], []>} : vector<8x128xbf16>, vector<128x256xbf16>, vector<8x256xf32> -> vector<8x256xf32>
    %c0_3 = arith.constant 0 : index
    %c0_4 = arith.constant 0 : index
    %3 = vector.load %arg3[%c0_3, %c0_4] : memref<1x256xf32, #tpu.memory_space<vmem>>, vector<1x256xf32>
    %4 = vector.broadcast %3 : vector<1x256xf32> to vector<8x256xf32>
    %5 = arith.addf %2, %4 : vector<8x256xf32>
    %cst_5 = arith.constant 0.000000e+00 : f32
    %6 = vector.broadcast %cst_5 : f32 to vector<8x256xf32>
    %7 = arith.cmpf ogt, %5, %6 : vector<8x256xf32>
    %cst_6 = arith.constant 2.000000e-01 : f32
    %8 = vector.broadcast %cst_6 : f32 to vector<8x256xf32>
    %9 = arith.mulf %8, %5 : vector<8x256xf32>
    %10 = arith.select %7, %5, %9 : vector<8x256xi1>, vector<8x256xf32>
    %11 = arith.truncf %10 : vector<8x256xf32> to vector<8x256xbf16>
    %c0_7 = arith.constant 0 : index
    %c0_8 = arith.constant 0 : index
    %12 = vector.load %arg4[%c0_7, %c0_8] : memref<256x512xbf16, #tpu.memory_space<vmem>>, vector<256x512xbf16>
    %cst_9 = arith.constant dense<0.000000e+00> : vector<8x512xf32>
    %13 = tpu.matmul %11, %12, %cst_9 {dimension_numbers = #tpu.dot_dimension_numbers<[1], [0], [0], [1], [0, 0, 1, 1], [], []>} : vector<8x256xbf16>, vector<256x512xbf16>, vector<8x512xf32> -> vector<8x512xf32>
    %c0_10 = arith.constant 0 : index
    %c0_11 = arith.constant 0 : index
    %14 = vector.load %arg5[%c0_10, %c0_11] : memref<1x512xf32, #tpu.memory_space<vmem>>, vector<1x512xf32>
    %15 = vector.broadcast %14 : vector<1x512xf32> to vector<8x512xf32>
    %16 = arith.addf %13, %15 : vector<8x512xf32>
    %cst_12 = arith.constant 0.000000e+00 : f32
    %17 = vector.broadcast %cst_12 : f32 to vector<8x512xf32>
    %18 = arith.cmpf ogt, %16, %17 : vector<8x512xf32>
    %cst_13 = arith.constant 2.000000e-01 : f32
    %19 = vector.broadcast %cst_13 : f32 to vector<8x512xf32>
    %20 = arith.mulf %19, %16 : vector<8x512xf32>
    %21 = arith.select %18, %16, %20 : vector<8x512xi1>, vector<8x512xf32>
    %22 = arith.truncf %21 : vector<8x512xf32> to vector<8x512xbf16>
    %c0_14 = arith.constant 0 : index
    %c0_15 = arith.constant 0 : index
    %23 = vector.load %arg6[%c0_14, %c0_15] : memref<512x784xbf16, #tpu.memory_space<vmem>>, vector<512x784xbf16>
    %cst_16 = arith.constant dense<0.000000e+00> : vector<8x784xf32>
    %24 = tpu.matmul %22, %23, %cst_16 {dimension_numbers = #tpu.dot_dimension_numbers<[1], [0], [0], [1], [0, 0, 1, 1], [], []>} : vector<8x512xbf16>, vector<512x784xbf16>, vector<8x784xf32> -> vector<8x784xf32>
    %c0_17 = arith.constant 0 : index
    %c0_18 = arith.constant 0 : index
    %25 = vector.load %arg7[%c0_17, %c0_18] : memref<1x784xf32, #tpu.memory_space<vmem>>, vector<1x784xf32>
    %26 = vector.broadcast %25 : vector<1x784xf32> to vector<8x784xf32>
    %27 = arith.addf %24, %26 : vector<8x784xf32>
    %c0_19 = arith.constant 0 : index
    %c0_20 = arith.constant 0 : index
    %28 = vector.load %arg8[%c0_19, %c0_20] : memref<8x784xf32, #tpu.memory_space<vmem>>, vector<8x784xf32>
    tpu.vector_store %arg8[%c0_19, %c0_20], %27 {strides = array<i32>} : memref<8x784xf32, #tpu.memory_space<vmem>>, vector<8x784xf32>,
    return
  }
  func.func @transform_0(%arg0: i32) -> (i32, i32) {
    %c0_i32 = arith.constant 0 : i32
    %c0_i32_0 = arith.constant 0 : i32
    return %arg0, %c0_i32 : i32, i32
  }
  func.func @transform_1(%arg0: i32) -> (i32, i32) {
    %c0_i32 = arith.constant 0 : i32
    %c0_i32_0 = arith.constant 0 : i32
    %c0_i32_1 = arith.constant 0 : i32
    return %c0_i32, %c0_i32_0 : i32, i32
  }
  func.func @transform_2(%arg0: i32) -> (i32, i32) {
    %c0_i32 = arith.constant 0 : i32
    %c0_i32_0 = arith.constant 0 : i32
    %c0_i32_1 = arith.constant 0 : i32
    return %c0_i32, %c0_i32_0 : i32, i32
  }
  func.func @transform_3(%arg0: i32) -> (i32, i32) {
    %c0_i32 = arith.constant 0 : i32
    %c0_i32_0 = arith.constant 0 : i32
    %c0_i32_1 = arith.constant 0 : i32
    return %c0_i32, %c0_i32_0 : i32, i32
  }
  func.func @transform_4(%arg0: i32) -> (i32, i32) {
    %c0_i32 = arith.constant 0 : i32
    %c0_i32_0 = arith.constant 0 : i32
    %c0_i32_1 = arith.constant 0 : i32
    return %c0_i32, %c0_i32_0 : i32, i32
  }
  func.func @transform_5(%arg0: i32) -> (i32, i32) {
    %c0_i32 = arith.constant 0 : i32
    %c0_i32_0 = arith.constant 0 : i32
    %c0_i32_1 = arith.constant 0 : i32
    return %c0_i32, %c0_i32_0 : i32, i32
  }
  func.func @transform_6(%arg0: i32) -> (i32, i32) {
    %c0_i32 = arith.constant 0 : i32
    %c0_i32_0 = arith.constant 0 : i32
    %c0_i32_1 = arith.constant 0 : i32
    return %c0_i32, %c0_i32_0 : i32, i32
  }
  func.func @transform_7(%arg0: i32) -> (i32, i32) {
    %c0_i32 = arith.constant 0 : i32
    %c0_i32_0 = arith.constant 0 : i32
    return %arg0, %c0_i32 : i32, i32
  }
}

</mosaic_0001>

<bundles_post_ra>
// kernel: decoder_forward.1
= control target key start
LH: loop header
LB: loop body
LE: loop exit
PB: predicated region body
PF: predicated region fallthrough
CT: control target
= control target key end

     0   :  { %s5983_s0 = inlined_call_operand.vmem [shape: bf16[8,128], index: 0, kind: input, shape index: {}]   ;;  %s5984_s1 = inlined_call_operand.vmem [shape: bf16[128,256], index: 1, kind: input, shape index: {}]   ;;  %s5985_s2 = inlined_call_operand.vmem [shape: f32[1,256], index: 2, kind: input, shape index: {}]   ;;  %s5986_s3 = inlined_call_operand.vmem [shape: bf16[256,512], index: 3, kind: input, shape index: {}]   ;;  %s5987_s4 = inlined_call_operand.vmem [shape: f32[1,512], index: 4, kind: input, shape index: {}]   ;;  %s5988_s5 = inlined_call_operand.vmem [shape: bf16[512,784], index: 5, kind: input, shape index: {}]   ;;  %s5989_s6 = inlined_call_operand.vmem [shape: f32[1,784], index: 6, kind: input, shape index: {}]   ;;  %s5990_s7 = inlined_call_operand.hbm [shape: f32[8,784], index: 7, kind: output, shape index: {}]  }
   0x1   :  { %v2548_v0 = vld [vmem:[%s5984_s1 + $0x70] sm:$0xf]  ;;  %v3721_v1 = vld [vmem:[%s5984_s1 + $0x74] sm:$0xf0]  ;;  %v3720_v2 = vld [vmem:[%s5984_s1 + $0x74] sm:$0xf] }
   0x2   :  { %v2549_v3 = vor.u32 %v3721_v1, %v2548_v0  ;;  %v2550_v4 = vld [vmem:[%s5984_s1 + $0x78] sm:$0xf0]  ;;  %v2540_v5 = vld [vmem:[%s5984_s1 + $0x60] sm:$0xf]  ;;  %v3719_v6 = vld [vmem:[%s5984_s1 + $0x64] sm:$0xf0] }
   0x3   :  { %v2553_v7 = vor.u32 %v3720_v2, %v2550_v4  ;;  %v3718_v8 = vld [vmem:[%s5984_s1 + $0x64] sm:$0xf]  ;;  %v2542_v9 = vld [vmem:[%s5984_s1 + $0x68] sm:$0xf0]  ;;  %v2541_v10 = vor.u32 %v3719_v6, %v2540_v5  ;;  %v2532_v12 = vld [vmem:[%s5984_s1 + $0x50] sm:$0xf] }
   0x4   :  { %130 = vmatpush.bf16.msra.mxu0 %v2549_v3  ;;  %v2545_v11 = vor.u32 %v3718_v8, %v2542_v9  ;;  %v3717_v13 = vld [vmem:[%s5984_s1 + $0x54] sm:$0xf0]  ;;  %v3716_v14 = vld [vmem:[%s5984_s1 + $0x54] sm:$0xf]  ;;  %v2534_v15 = vld [vmem:[%s5984_s1 + $0x58] sm:$0xf0] }
   0x5   :  { %143 = vmatpush.bf16.msra.mxu1 %v2553_v7  ;;  %v2533_v16 = vor.u32 %v3717_v13, %v2532_v12  ;;  %v2537_v17 = vor.u32 %v3716_v14, %v2534_v15  ;;  %v2524_v18 = vld [vmem:[%s5984_s1 + $0x40] sm:$0xf]  ;;  %v3715_v19 = vld [vmem:[%s5984_s1 + $0x44] sm:$0xf0]  ;;  %v3714_v20 = vld [vmem:[%s5984_s1 + $0x44] sm:$0xf] }
   0x6   :  { %v2526_v21 = vld [vmem:[%s5984_s1 + $0x48] sm:$0xf0]  ;;  %v2525_v22 = vor.u32 %v3715_v19, %v2524_v18  ;;  %v2668_v23 = vld [vmem:[%s5986_s3 + $0xe0] sm:$0xf]  ;;  %v3752_v24 = vld [vmem:[%s5986_s3 + $0xec] sm:$0xf0] }
   0x7   :  { %v2796_v25 = vld [vmem:[%s5986_s3 + $0x1e0] sm:$0xf]  ;;  %v2529_v26 = vor.u32 %v3714_v20, %v2526_v21  ;;  %v2516_v27 = vld [vmem:[%s5984_s1 + $0x30] sm:$0xf]  ;;  %v3713_v28 = vld [vmem:[%s5984_s1 + $0x34] sm:$0xf0]  ;;  %v2669_v29 = vor.u32 %v3752_v24, %v2668_v23 }
   0x8   :  { %131 = vmatpush.bf16.msra.mxu0 %v2541_v10  ;;  %v3784_v30 = vld [vmem:[%s5986_s3 + $0x1ec] sm:$0xf0]  ;;  %v3712_v31 = vld [vmem:[%s5984_s1 + $0x34] sm:$0xf]  ;;  %v2518_v32 = vld [vmem:[%s5984_s1 + $0x38] sm:$0xf0]  ;;  %v2517_v38 = vor.u32 %v3713_v28, %v2516_v27 }
   0x9   :  { %144 = vmatpush.bf16.msra.mxu1 %v2545_v11  ;;  %v2797_v33 = vor.u32 %v3784_v30, %v2796_v25  ;;  %v2652_v34 = vld [vmem:[%s5986_s3 + $0xc0] sm:$0xf]  ;;  %558 = vmatpush.bf16.msra.mxu2 %v2669_v29  ;;  %v3748_v35 = vld [vmem:[%s5986_s3 + $0xcc] sm:$0xf0]  ;;  %v3711_v40 = vld [vmem:[%s5984_s1 + $0x24] sm:$0xf0]  ;;  %v2521_v43 = vor.u32 %v3712_v31, %v2518_v32 }
   0xa   :  { %v2780_v36 = vld [vmem:[%s5986_s3 + $0x1c0] sm:$0xf]  ;;  %v3780_v37 = vld [vmem:[%s5986_s3 + $0x1cc] sm:$0xf0]  ;;  %v2653_v41 = vor.u32 %v3748_v35, %v2652_v34  ;;  %v3710_v44 = vld [vmem:[%s5984_s1 + $0x24] sm:$0xf] }
   0xb   :  { %v2508_v39 = vld [vmem:[%s5984_s1 + $0x20] sm:$0xf]  ;;  %571 = vmatpush.bf16.msra.mxu3 %v2797_v33  ;;  %v2781_v42 = vor.u32 %v3780_v37, %v2780_v36  ;;  %v3744_v46 = vld [vmem:[%s5986_s3 + $0xac] sm:$0xf0]  ;;  %v2510_v47 = vld [vmem:[%s5984_s1 + $0x28] sm:$0xf0] }
   0xc   :  { %132 = vmatpush.bf16.msra.mxu0 %v2533_v16  ;;  %v2636_v45 = vld [vmem:[%s5986_s3 + $0xa0] sm:$0xf]  ;;  %v3776_v49 = vld [vmem:[%s5986_s3 + $0x1ac] sm:$0xf0]  ;;  %v2509_v51 = vor.u32 %v3711_v40, %v2508_v39  ;;  %v2513_v56 = vor.u32 %v3710_v44, %v2510_v47  ;;  %v3709_v57 = vld [vmem:[%s5984_s1 + $0x14] sm:$0xf0] }
   0xd   :  { %145 = vmatpush.bf16.msra.mxu1 %v2537_v17  ;;  %v2764_v48 = vld [vmem:[%s5986_s3 + $0x1a0] sm:$0xf]  ;;  %559 = vmatpush.bf16.msra.mxu2 %v2653_v41  ;;  %v2637_v50 = vor.u32 %v3744_v46, %v2636_v45  ;;  %v2500_v52 = vld [vmem:[%s5984_s1 + $0x10] sm:$0xf]  ;;  %v3708_v60 = vld [vmem:[%s5984_s1 + $0x14] sm:$0xf] }
   0xe   :  { %v2765_v53 = vor.u32 %v3776_v49, %v2764_v48  ;;  %v2620_v54 = vld [vmem:[%s5986_s3 + $0x80] sm:$0xf]  ;;  %v3740_v55 = vld [vmem:[%s5986_s3 + $0x8c] sm:$0xf0]  ;;  %v2502_v61 = vld [vmem:[%s5984_s1 + $0x18] sm:$0xf0]  ;;  %v2501_v0 = vor.u32 %v3709_v57, %v2500_v52 }
   0xf   :  { %572 = vmatpush.bf16.msra.mxu3 %v2781_v42  ;;  %v2748_v58 = vld [vmem:[%s5986_s3 + $0x180] sm:$0xf]  ;;  %v3772_v59 = vld [vmem:[%s5986_s3 + $0x18c] sm:$0xf0]  ;;  %v2621_v63 = vor.u32 %v3740_v55, %v2620_v54  ;;  %v3707_v1 = vld [vmem:[%s5984_s1 + $0x4] sm:$0xf0]  ;;  %v2505_v5 = vor.u32 %v3708_v60, %v2502_v61 }
  0x10   :  { %133 = vmatpush.bf16.msra.mxu0 %v2525_v22  ;;  %v2492_v62 = vld [vmem:[%s5984_s1] sm:$0xf]  ;;  %v2749_v2 = vor.u32 %v3772_v59, %v2748_v58  ;;  %v3736_v4 = vld [vmem:[%s5986_s3 + $0x6c] sm:$0xf0]  ;;  %v3706_v6 = vld [vmem:[%s5984_s1 + $0x4] sm:$0xf] }
  0x11   :  { %146 = vmatpush.bf16.msra.mxu1 %v2529_v26  ;;  %560 = vmatpush.bf16.msra.mxu2 %v2637_v50  ;;  %v2604_v3 = vld [vmem:[%s5986_s3 + $0x60] sm:$0xf]  ;;  %v3768_v8 = vld [vmem:[%s5986_s3 + $0x16c] sm:$0xf0]  ;;  %v2494_v9 = vld [vmem:[%s5984_s1 + $0x8] sm:$0xf0]  ;;  %v2493_v15 = vor.u32 %v3707_v1, %v2492_v62 }
  0x12   :  { %v2732_v7 = vld [vmem:[%s5986_s3 + $0x160] sm:$0xf]  ;;  %v3750_v10 = vld [vmem:[%s5986_s3 + $0xe4] sm:$0xf]  ;;  %v2670_v11 = vld [vmem:[%s5986_s3 + $0xf0] sm:$0xf0]  ;;  %v2605_v14 = vor.u32 %v3736_v4, %v2604_v3  ;;  %v2497_v19 = vor.u32 %v3706_v6, %v2494_v9 }
  0x13   :  { %573 = vmatpush.bf16.msra.mxu3 %v2765_v53  ;;  %v3782_v12 = vld [vmem:[%s5986_s3 + $0x1e4] sm:$0xf]  ;;  %v2798_v13 = vld [vmem:[%s5986_s3 + $0x1f0] sm:$0xf0]  ;;  %v2733_v16 = vor.u32 %v3768_v8, %v2732_v7  ;;  %v2588_v17 = vld [vmem:[%s5986_s3 + $0x40] sm:$0xf]  ;;  %v2673_v20 = vor.u32 %v3750_v10, %v2670_v11 }
  0x14   :  { %134 = vmatpush.bf16.msra.mxu0 %v2517_v38  ;;  %v3732_v18 = vld [vmem:[%s5986_s3 + $0x4c] sm:$0xf0]  ;;  %v2716_v21 = vld [vmem:[%s5986_s3 + $0x140] sm:$0xf]  ;;  %v2801_v23 = vor.u32 %v3782_v12, %v2798_v13  ;;  %v3746_v24 = vld [vmem:[%s5986_s3 + $0xc4] sm:$0xf] }
  0x15   :  { %147 = vmatpush.bf16.msra.mxu1 %v2521_v43  ;;  %561 = vmatpush.bf16.msra.mxu2 %v2621_v63  ;;  %v3764_v22 = vld [vmem:[%s5986_s3 + $0x14c] sm:$0xf0]  ;;  %v2654_v25 = vld [vmem:[%s5986_s3 + $0xd0] sm:$0xf0]  ;;  %v3778_v26 = vld [vmem:[%s5986_s3 + $0x1c4] sm:$0xf]  ;;  %v2589_v28 = vor.u32 %v3732_v18, %v2588_v17 }
  0x16   :  { %v2782_v27 = vld [vmem:[%s5986_s3 + $0x1d0] sm:$0xf0]  ;;  %v27_v29 = vld [vmem:[%s5983_s0] sm:$0xf]  ;;  %v2717_v30 = vor.u32 %v3764_v22, %v2716_v21  ;;  %v3728_v32 = vld [vmem:[%s5986_s3 + $0x2c] sm:$0xf0]  ;;  %v2657_v33 = vor.u32 %v3746_v24, %v2654_v25 }
  0x17   :  { %574 = vmatpush.bf16.msra.mxu3 %v2749_v2  ;;  %v2572_v31 = vld [vmem:[%s5986_s3 + $0x20] sm:$0xf]  ;;  %v3760_v35 = vld [vmem:[%s5986_s3 + $0x12c] sm:$0xf0]  ;;  %v2785_v36 = vor.u32 %v3778_v26, %v2782_v27  ;;  %v3742_v37 = vld [vmem:[%s5986_s3 + $0xa4] sm:$0xf] }
  0x18   :  { %135 = vmatpush.bf16.msra.mxu0 %v2509_v51  ;;  %v2700_v34 = vld [vmem:[%s5986_s3 + $0x120] sm:$0xf]  ;;  %v2638_v38 = vld [vmem:[%s5986_s3 + $0xb0] sm:$0xf0]  ;;  %v3774_v39 = vld [vmem:[%s5986_s3 + $0x1a4] sm:$0xf]  ;;  %v2573_v41 = vor.u32 %v3728_v32, %v2572_v31 }
  0x19   :  { %148 = vmatpush.bf16.msra.mxu1 %v2513_v56  ;;  %562 = vmatpush.bf16.msra.mxu2 %v2605_v14  ;;  %v2766_v40 = vld [vmem:[%s5986_s3 + $0x1b0] sm:$0xf0]  ;;  %v3738_v42 = vld [vmem:[%s5986_s3 + $0x84] sm:$0xf]  ;;  %v2701_v43 = vor.u32 %v3760_v35, %v2700_v34  ;;  %v2556_v44 = vld [vmem:[%s5986_s3] sm:$0xf]  ;;  %v2641_v47 = vor.u32 %v3742_v37, %v2638_v38 }
  0x1a   :  { %v3724_v45 = vld [vmem:[%s5986_s3 + $0xc] sm:$0xf0]  ;;  %v2684_v46 = vld [vmem:[%s5986_s3 + $0x100] sm:$0xf]  ;;  %v2676_v49 = vld [vmem:[%s5986_s3 + $0xe8] sm:$0xf]  ;;  %v2769_v51 = vor.u32 %v3774_v39, %v2766_v40 }
  0x1b   :  { %575 = vmatpush.bf16.msra.mxu3 %v2733_v16  ;;  %v3756_v48 = vld [vmem:[%s5986_s3 + $0x10c] sm:$0xf0]  ;;  %v3753_v50 = vld [vmem:[%s5986_s3 + $0xf4] sm:$0xf0]  ;;  %v2622_v52 = vld [vmem:[%s5986_s3 + $0x90] sm:$0xf0]  ;;  %v2557_v57 = vor.u32 %v3724_v45, %v2556_v44 }
  0x1c   :  { %136 = vmatpush.bf16.msra.mxu0 %v2501_v0  ;;  %v2804_v53 = vld [vmem:[%s5986_s3 + $0x1e8] sm:$0xf]  ;;  %v3785_v54 = vld [vmem:[%s5986_s3 + $0x1f4] sm:$0xf0]  ;;  %v3770_v55 = vld [vmem:[%s5986_s3 + $0x184] sm:$0xf] }
  0x1d   :  { %149 = vmatpush.bf16.msra.mxu1 %v2505_v5  ;;  %563 = vmatpush.bf16.msra.mxu2 %v2589_v28  ;;  %v2750_v56 = vld [vmem:[%s5986_s3 + $0x190] sm:$0xf0] }
  0x1f   :  { %576 = vmatpush.bf16.msra.mxu3 %v2717_v30 }
  0x20   :  { %137 = vmatpush.bf16.msra.mxu0 %v2493_v15 }
  0x21   :  { %150 = vmatpush.bf16.msra.mxu1 %v2497_v19  ;;  %564 = vmatpush.bf16.msra.mxu2 %v2573_v41 }
  0x23   :  { %138 = vmatmul.bf16.vlgmr.msra.gmra.mxu0 %v27_v29 }
  0x24   :  { %584 = vmatpush.bf16.msrb.mxu0 %v2673_v20  ;;  %151 = vmatmul.bf16.vlgmr.msra.gmra.mxu1 %v27_v29 }
  0x25   :  { %597 = vmatpush.bf16.msrb.mxu1 %v2801_v23 }
  0x28   :  { %585 = vmatpush.bf16.msrb.mxu0 %v2657_v33 }
  0x29   :  { %598 = vmatpush.bf16.msrb.mxu1 %v2785_v36 }
  0x2a   :  { %12 = vsyncpa [#allocation3], 0  ;;  %577 = vmatpush.bf16.msra.mxu3 %v2701_v43  ;;  %v2685_v58 = vor.u32 %v3756_v48, %v2684_v46  ;;  %v2677_v59 = vor.u32 %v3753_v50, %v2676_v49  ;;  %v2625_v60 = vor.u32 %v3738_v42, %v2622_v52  ;;  %v3734_v61 = vld [vmem:[%s5986_s3 + $0x64] sm:$0xf]  ;;  %v2805_v62 = vor.u32 %v3785_v54, %v2804_v53  ;;  %v2660_v63 = vld [vmem:[%s5986_s3 + $0xc8] sm:$0xf] }
  0x2b   :  { %v3749_v0 = vld [vmem:[%s5986_s3 + $0xd4] sm:$0xf0]  ;;  %v2753_v1 = vor.u32 %v3770_v55, %v2750_v56  ;;  %v2606_v2 = vld [vmem:[%s5986_s3 + $0x70] sm:$0xf0]  ;;  %v2788_v3 = vld [vmem:[%s5986_s3 + $0x1c8] sm:$0xf]  ;;  %565 = vmatpush.bf16.msra.mxu2 %v2557_v57 }
  0x2c   :  { %586 = vmatpush.bf16.msrb.mxu0 %v2641_v47  ;;  %v3781_v4 = vld [vmem:[%s5986_s3 + $0x1d4] sm:$0xf0]  ;;  %v3766_v5 = vld [vmem:[%s5986_s3 + $0x164] sm:$0xf]  ;;  %v2734_v6 = vld [vmem:[%s5986_s3 + $0x170] sm:$0xf0]  ;;  %v2661_v7 = vor.u32 %v3749_v0, %v2660_v63  ;;  %v2609_v8 = vor.u32 %v3734_v61, %v2606_v2 }
  0x2d   :  { %599 = vmatpush.bf16.msrb.mxu1 %v2769_v51  ;;  %v2789_v9 = vor.u32 %v3781_v4, %v2788_v3  ;;  %v2737_v10 = vor.u32 %v3766_v5, %v2734_v6  ;;  %v3730_v11 = vld [vmem:[%s5986_s3 + $0x44] sm:$0xf]  ;;  %v2590_v12 = vld [vmem:[%s5986_s3 + $0x50] sm:$0xf0]  ;;  %v3751_v27 = vld [vmem:[%s5986_s3 + $0xec] sm:$0xf] }
  0x2e   :  { %578 = vmatpush.bf16.msra.mxu3 %v2685_v58  ;;  %v3762_v13 = vld [vmem:[%s5986_s3 + $0x144] sm:$0xf]  ;;  %v2718_v14 = vld [vmem:[%s5986_s3 + $0x150] sm:$0xf0]  ;;  %v2593_v15 = vor.u32 %v3730_v11, %v2590_v12  ;;  %v2678_v28 = vld [vmem:[%s5986_s3 + $0xf8] sm:$0xf0] }
  0x2f   :  { %610 = vmatpush.bf16.msrb.mxu2 %v2677_v59  ;;  %v2721_v16 = vor.u32 %v3762_v13, %v2718_v14  ;;  %v3726_v17 = vld [vmem:[%s5986_s3 + $0x24] sm:$0xf]  ;;  %v2574_v18 = vld [vmem:[%s5986_s3 + $0x30] sm:$0xf0]  ;;  %v3783_v29 = vld [vmem:[%s5986_s3 + $0x1ec] sm:$0xf]  ;;  %v2681_v33 = vor.u32 %v3751_v27, %v2678_v28 }
  0x30   :  { %587 = vmatpush.bf16.msrb.mxu0 %v2625_v60  ;;  %v3758_v19 = vld [vmem:[%s5986_s3 + $0x124] sm:$0xf]  ;;  %v2702_v20 = vld [vmem:[%s5986_s3 + $0x130] sm:$0xf0]  ;;  %v2577_v21 = vor.u32 %v3726_v17, %v2574_v18  ;;  %v2806_v30 = vld [vmem:[%s5986_s3 + $0x1f8] sm:$0xf0] }
  0x31   :  { %600 = vmatpush.bf16.msrb.mxu1 %v2753_v1  ;;  %v2705_v22 = vor.u32 %v3758_v19, %v2702_v20  ;;  %v3722_v23 = vld [vmem:[%s5986_s3 + $0x4] sm:$0xf]  ;;  %v2558_v24 = vld [vmem:[%s5986_s3 + $0x10] sm:$0xf0]  ;;  %v2809_v34 = vor.u32 %v3783_v29, %v2806_v30  ;;  %v3747_v35 = vld [vmem:[%s5986_s3 + $0xcc] sm:$0xf] }
  0x32   :  { %623 = vmatpush.bf16.msrb.mxu3 %v2805_v62  ;;  %v3754_v25 = vld [vmem:[%s5986_s3 + $0x104] sm:$0xf]  ;;  %v2686_v26 = vld [vmem:[%s5986_s3 + $0x110] sm:$0xf0]  ;;  %v2561_v31 = vor.u32 %v3722_v23, %v2558_v24  ;;  %v2662_v36 = vld [vmem:[%s5986_s3 + $0xd8] sm:$0xf0] }
  0x33   :  { %611 = vmatpush.bf16.msrb.mxu2 %v2661_v7  ;;  %v2689_v32 = vor.u32 %v3754_v25, %v2686_v26  ;;  %v3779_v37 = vld [vmem:[%s5986_s3 + $0x1cc] sm:$0xf]  ;;  %v2790_v38 = vld [vmem:[%s5986_s3 + $0x1d8] sm:$0xf0]  ;;  %v2665_v39 = vor.u32 %v3747_v35, %v2662_v36  ;;  %v2644_v41 = vld [vmem:[%s5986_s3 + $0xa8] sm:$0xf] }
  0x34   :  { %588 = vmatpush.bf16.msrb.mxu0 %v2609_v8  ;;  %v2793_v40 = vor.u32 %v3779_v37, %v2790_v38  ;;  %v3745_v42 = vld [vmem:[%s5986_s3 + $0xb4] sm:$0xf0]  ;;  %v2772_v43 = vld [vmem:[%s5986_s3 + $0x1a8] sm:$0xf]  ;;  %v3743_v46 = vld [vmem:[%s5986_s3 + $0xac] sm:$0xf] }
  0x35   :  { %601 = vmatpush.bf16.msrb.mxu1 %v2737_v10  ;;  %v2645_v44 = vor.u32 %v3745_v42, %v2644_v41  ;;  %v3777_v45 = vld [vmem:[%s5986_s3 + $0x1b4] sm:$0xf0]  ;;  %v2646_v48 = vld [vmem:[%s5986_s3 + $0xb8] sm:$0xf0]  ;;  %v3775_v49 = vld [vmem:[%s5986_s3 + $0x1ac] sm:$0xf] }
  0x36   :  { %624 = vmatpush.bf16.msrb.mxu3 %v2789_v9  ;;  %v2773_v47 = vor.u32 %v3777_v45, %v2772_v43  ;;  %v2774_v50 = vld [vmem:[%s5986_s3 + $0x1b8] sm:$0xf0]  ;;  %v2649_v51 = vor.u32 %v3743_v46, %v2646_v48  ;;  %v2628_v53 = vld [vmem:[%s5986_s3 + $0x88] sm:$0xf]  ;;  %v3741_v54 = vld [vmem:[%s5986_s3 + $0x94] sm:$0xf0] }
  0x37   :  { %612 = vmatpush.bf16.msrb.mxu2 %v2645_v44  ;;  %v2777_v52 = vor.u32 %v3775_v49, %v2774_v50  ;;  %v2756_v55 = vld [vmem:[%s5986_s3 + $0x188] sm:$0xf]  ;;  %v2629_v56 = vor.u32 %v3741_v54, %v2628_v53  ;;  %v3773_v57 = vld [vmem:[%s5986_s3 + $0x194] sm:$0xf0]  ;;  %v3739_v58 = vld [vmem:[%s5986_s3 + $0x8c] sm:$0xf] }
  0x38   :  { %589 = vmatpush.bf16.msrb.mxu0 %v2593_v15  ;;  %v2630_v59 = vld [vmem:[%s5986_s3 + $0x98] sm:$0xf0]  ;;  %v2757_v60 = vor.u32 %v3773_v57, %v2756_v55  ;;  %v3771_v62 = vld [vmem:[%s5986_s3 + $0x18c] sm:$0xf]  ;;  %v2612_v1 = vld [vmem:[%s5986_s3 + $0x68] sm:$0xf] }
  0x39   :  { %602 = vmatpush.bf16.msrb.mxu1 %v2721_v16  ;;  %v2633_v61 = vor.u32 %v3739_v58, %v2630_v59  ;;  %v2758_v63 = vld [vmem:[%s5986_s3 + $0x198] sm:$0xf0]  ;;  %v3737_v2 = vld [vmem:[%s5986_s3 + $0x74] sm:$0xf0]  ;;  %v2740_v3 = vld [vmem:[%s5986_s3 + $0x168] sm:$0xf] }
  0x3a   :  { %625 = vmatpush.bf16.msrb.mxu3 %v2773_v47  ;;  %v2761_v0 = vor.u32 %v3771_v62, %v2758_v63  ;;  %v2613_v4 = vor.u32 %v3737_v2, %v2612_v1  ;;  %v3769_v5 = vld [vmem:[%s5986_s3 + $0x174] sm:$0xf0]  ;;  %v3735_v6 = vld [vmem:[%s5986_s3 + $0x6c] sm:$0xf]  ;;  %v2614_v7 = vld [vmem:[%s5986_s3 + $0x78] sm:$0xf0] }
  0x3b   :  { %613 = vmatpush.bf16.msrb.mxu2 %v2629_v56  ;;  %v2741_v8 = vor.u32 %v3769_v5, %v2740_v3  ;;  %v2617_v9 = vor.u32 %v3735_v6, %v2614_v7  ;;  %v3767_v10 = vld [vmem:[%s5986_s3 + $0x16c] sm:$0xf]  ;;  %v2742_v11 = vld [vmem:[%s5986_s3 + $0x178] sm:$0xf0]  ;;  %v2596_v12 = vld [vmem:[%s5986_s3 + $0x48] sm:$0xf] }
  0x3c   :  { %590 = vmatpush.bf16.msrb.mxu0 %v2577_v21  ;;  %v2745_v13 = vor.u32 %v3767_v10, %v2742_v11  ;;  %v3733_v14 = vld [vmem:[%s5986_s3 + $0x54] sm:$0xf0]  ;;  %v2724_v15 = vld [vmem:[%s5986_s3 + $0x148] sm:$0xf]  ;;  %v3731_v19 = vld [vmem:[%s5986_s3 + $0x4c] sm:$0xf] }
  0x3d   :  { %603 = vmatpush.bf16.msrb.mxu1 %v2705_v22  ;;  %v3765_v16 = vld [vmem:[%s5986_s3 + $0x154] sm:$0xf0]  ;;  %v2597_v17 = vor.u32 %v3733_v14, %v2596_v12  ;;  %v2598_v20 = vld [vmem:[%s5986_s3 + $0x58] sm:$0xf0]  ;;  %v3763_v21 = vld [vmem:[%s5986_s3 + $0x14c] sm:$0xf] }
  0x3e   :  { %626 = vmatpush.bf16.msrb.mxu3 %v2757_v60  ;;  %v2725_v18 = vor.u32 %v3765_v16, %v2724_v15  ;;  %v2601_v22 = vor.u32 %v3731_v19, %v2598_v20  ;;  %v2726_v23 = vld [vmem:[%s5986_s3 + $0x158] sm:$0xf0]  ;;  %v2580_v24 = vld [vmem:[%s5986_s3 + $0x28] sm:$0xf]  ;;  %v3729_v25 = vld [vmem:[%s5986_s3 + $0x34] sm:$0xf0] }
  0x3f   :  { %614 = vmatpush.bf16.msrb.mxu2 %v2613_v4  ;;  %v2729_v26 = vor.u32 %v3763_v21, %v2726_v23  ;;  %v2708_v27 = vld [vmem:[%s5986_s3 + $0x128] sm:$0xf]  ;;  %v3761_v28 = vld [vmem:[%s5986_s3 + $0x134] sm:$0xf0]  ;;  %v3727_v29 = vld [vmem:[%s5986_s3 + $0x2c] sm:$0xf]  ;;  %v2581_v30 = vor.u32 %v3729_v25, %v2580_v24 }
  0x40   :  { %591 = vmatpush.bf16.msrb.mxu0 %v2561_v31  ;;  %v2582_v31 = vld [vmem:[%s5986_s3 + $0x38] sm:$0xf0]  ;;  %v2564_v35 = vld [vmem:[%s5986_s3 + $0x8] sm:$0xf]  ;;  %v3725_v36 = vld [vmem:[%s5986_s3 + $0x14] sm:$0xf0] }
  0x41   :  { %604 = vmatpush.bf16.msrb.mxu1 %v2689_v32  ;;  %v3759_v32 = vld [vmem:[%s5986_s3 + $0x12c] sm:$0xf]  ;;  %v2585_v37 = vor.u32 %v3727_v29, %v2582_v31  ;;  %v2566_v42 = vld [vmem:[%s5986_s3 + $0x18] sm:$0xf0]  ;;  %v2565_v45 = vor.u32 %v3725_v36, %v2564_v35  ;;  %v44_v49 = vld [vmem:[%s5985_s2] sm:$0x3] }
  0x42   :  { %627 = vmatpush.bf16.msrb.mxu3 %v2741_v8  ;;  %v3723_v41 = vld [vmem:[%s5986_s3 + $0xc] sm:$0xf]  ;;  %v2694_v44 = vld [vmem:[%s5986_s3 + $0x118] sm:$0xf0]  ;;  %v46_v50 = vperm.slane %v44_v49, 0  ;;  %s2481_s20 = sshll.u32 %s5990_s7, 4  ;;  %s2482_s20 = int_to_ptr.hbm [resolvable:$true] %s2481_s20 }
  0x43   :  { %615 = vmatpush.bf16.msrb.mxu2 %v2597_v17  ;;  %v3755_v43 = vld [vmem:[%s5986_s3 + $0x10c] sm:$0xf]  ;;  %v2569_v47 = vor.u32 %v3723_v41, %v2566_v42  ;;  %v3232_v55 = vld [vmem:[%s5988_s5 + $0x348] sm:$0xf]  ;;  %v3894_v56 = vld [vmem:[%s5988_s5 + $0x360] sm:$0xf0] }
  0x44   :  { %636 = vmatpush.bf16.msra.mxu0 %v2681_v33  ;;  %v2710_v33 = vld [vmem:[%s5986_s3 + $0x138] sm:$0xf0]  ;;  %v2697_v48 = vor.u32 %v3755_v43, %v2694_v44  ;;  %v3008_v57 = vld [vmem:[%s5988_s5 + $0x188] sm:$0xf]  ;;  %v3838_v59 = vld [vmem:[%s5988_s5 + $0x1a0] sm:$0xf0]  ;;  %v3233_v5 = vor.u32 %v3894_v56, %v3232_v55 }
  0x45   :  { %649 = vmatpush.bf16.msra.mxu1 %v2809_v34  ;;  %v2709_v34 = vor.u32 %v3761_v28, %v2708_v27  ;;  %v2713_v38 = vor.u32 %v3759_v32, %v2710_v33  ;;  %v3680_v60 = vld [vmem:[%s5988_s5 + $0x6c8] sm:$0xf]  ;;  %v3950_v1 = vld [vmem:[%s5988_s5 + $0x520] sm:$0xf0]  ;;  %v3204_v6 = vld [vmem:[%s5988_s5 + $0x310] sm:$0xf]  ;;  %v3009_v8 = vor.u32 %v3838_v59, %v3008_v57 }
  0x46   :  { %628 = vmatpush.bf16.msrb.mxu3 %v2725_v18  ;;  %v3456_v63 = vld [vmem:[%s5988_s5 + $0x508] sm:$0xf]  ;;  %v3887_v7 = vld [vmem:[%s5988_s5 + $0x328] sm:$0xf0]  ;;  %v2980_v10 = vld [vmem:[%s5988_s5 + $0x150] sm:$0xf] }
  0x47   :  { %616 = vmatpush.bf16.msrb.mxu2 %v2581_v30  ;;  %v3831_v11 = vld [vmem:[%s5988_s5 + $0x168] sm:$0xf0]  ;;  %v3457_v14 = vor.u32 %v3950_v1, %v3456_v63  ;;  %v3428_v17 = vld [vmem:[%s5988_s5 + $0x4d0] sm:$0xf]  ;;  %v3205_v20 = vor.u32 %v3887_v7, %v3204_v6  ;;  %v3176_v21 = vld [vmem:[%s5988_s5 + $0x2d8] sm:$0xf] }
  0x48   :  { %637 = vmatpush.bf16.msra.mxu0 %v2665_v39  ;;  %v2692_v39 = vld [vmem:[%s5986_s3 + $0x108] sm:$0xf]  ;;  %v3999_v16 = vld [vmem:[%s5988_s5 + $0x6a8] sm:$0xf0]  ;;  %v2981_v23 = vor.u32 %v3831_v11, %v2980_v10  ;;  %v2952_v24 = vld [vmem:[%s5988_s5 + $0x118] sm:$0xf] }
  0x49   :  { %650 = vmatpush.bf16.msra.mxu1 %v2793_v40  ;;  %v3757_v40 = vld [vmem:[%s5986_s3 + $0x114] sm:$0xf0]  ;;  %v3943_v18 = vld [vmem:[%s5988_s5 + $0x4e8] sm:$0xf0]  ;;  %v3824_v25 = vld [vmem:[%s5988_s5 + $0x130] sm:$0xf0] }
  0x4a   :  { %629 = vmatpush.bf16.msrb.mxu3 %v2709_v34  ;;  %v2693_v46 = vor.u32 %v3757_v40, %v2692_v39  ;;  %v3624_v27 = vld [vmem:[%s5988_s5 + $0x658] sm:$0xf]  ;;  %v3429_v28 = vor.u32 %v3943_v18, %v3428_v17  ;;  %v3992_v29 = vld [vmem:[%s5988_s5 + $0x670] sm:$0xf0]  ;;  %v3148_v33 = vld [vmem:[%s5988_s5 + $0x2a0] sm:$0xf]  ;;  %v2953_v35 = vor.u32 %v3824_v25, %v2952_v24 }
  0x4b   :  { %617 = vmatpush.bf16.msrb.mxu2 %v2565_v45  ;;  %v3400_v30 = vld [vmem:[%s5988_s5 + $0x498] sm:$0xf]  ;;  %v3936_v31 = vld [vmem:[%s5988_s5 + $0x4b0] sm:$0xf0]  ;;  %v3873_v34 = vld [vmem:[%s5988_s5 + $0x2b8] sm:$0xf0] }
  0x4c   :  { %638 = vmatpush.bf16.msra.mxu0 %v2649_v51  ;;  %v47_v51 = vperm.slane %v44_v49, 1  ;;  %v2924_v36 = vld [vmem:[%s5988_s5 + $0xe0] sm:$0xf]  ;;  %v3401_v40 = vor.u32 %v3936_v31, %v3400_v30  ;;  %v3985_v41 = vld [vmem:[%s5988_s5 + $0x638] sm:$0xf0]  ;;  %v3149_v44 = vor.u32 %v3873_v34, %v3148_v33  ;;  %vm2472_vm6 = vcmask 130048  }
  0x4d   :  { %651 = vmatpush.bf16.msra.mxu1 %v2777_v52  ;;  %v3596_v39 = vld [vmem:[%s5988_s5 + $0x620] sm:$0xf]  ;;  %v3929_v43 = vld [vmem:[%s5988_s5 + $0x478] sm:$0xf0]  ;;  %v3120_v45 = vld [vmem:[%s5988_s5 + $0x268] sm:$0xf] }
  0x4e   :  { %630 = vmatpush.bf16.msrb.mxu3 %v2693_v46  ;;  %v3372_v42 = vld [vmem:[%s5988_s5 + $0x460] sm:$0xf]  ;;  %v3866_v46 = vld [vmem:[%s5988_s5 + $0x280] sm:$0xf0]  ;;  %v3092_v57 = vld [vmem:[%s5988_s5 + $0x230] sm:$0xf] }
  0x4f   :  { %v3810_v49 = vld [vmem:[%s5988_s5 + $0xc0] sm:$0xf0]  ;;  %v3121_v56 = vor.u32 %v3866_v46, %v3120_v45  ;;  %v3540_v63 = vld [vmem:[%s5988_s5 + $0x5b0] sm:$0xf]  ;;  %v3971_v1 = vld [vmem:[%s5988_s5 + $0x5c8] sm:$0xf0] }
  0x50   :  { %639 = vmatpush.bf16.msra.mxu0 %v2633_v61  ;;  %v4006_v61 = vld [vmem:[%s5988_s5 + $0x6e0] sm:$0xf0]  ;;  %v3852_v6 = vld [vmem:[%s5988_s5 + $0x210] sm:$0xf0]  ;;  %v3541_v10 = vor.u32 %v3971_v1, %v3540_v63  ;;  %v3512_v11 = vld [vmem:[%s5988_s5 + $0x578] sm:$0xf] }
  0x51   :  { %652 = vmatpush.bf16.msra.mxu1 %v2761_v0  ;;  %v3681_v12 = vor.u32 %v4006_v61, %v3680_v60  ;;  %v3922_v55 = vld [vmem:[%s5988_s5 + $0x440] sm:$0xf0]  ;;  %v2868_v60 = vld [vmem:[%s5988_s5 + $0x70] sm:$0xf]  ;;  %v3803_v61 = vld [vmem:[%s5988_s5 + $0x88] sm:$0xf0] }
  0x52   :  { %v2869_v7 = vor.u32 %v3803_v61, %v2868_v60  ;;  %v3036_v17 = vld [vmem:[%s5988_s5 + $0x1c0] sm:$0xf]  ;;  %v3845_v18 = vld [vmem:[%s5988_s5 + $0x1d8] sm:$0xf0]  ;;  %v3234_v25 = vld [vmem:[%s5988_s5 + $0x364] sm:$0xf0] }
  0x53   :  { %v3037_v30 = vor.u32 %v3845_v18, %v3036_v17  ;;  %v3682_v33 = vld [vmem:[%s5988_s5 + $0x6e4] sm:$0xf0]  ;;  %v3178_v45 = vld [vmem:[%s5988_s5 + $0x2f4] sm:$0xf0]  ;;  %v3821_v46 = vld [vmem:[%s5988_s5 + $0x11c] sm:$0xf] }
  0x54   :  { %640 = vmatpush.bf16.msra.mxu0 %v2617_v9  ;;  %v3094_v60 = vld [vmem:[%s5988_s5 + $0x24c] sm:$0xf0]  ;;  %v3996_v61 = vld [vmem:[%s5988_s5 + $0x694] sm:$0xf]  ;;  %v3901_v1 = vld [vmem:[%s5988_s5 + $0x398] sm:$0xf0] }
  0x55   :  { %653 = vmatpush.bf16.msra.mxu1 %v2745_v13  ;;  %v3652_v13 = vld [vmem:[%s5988_s5 + $0x690] sm:$0xf]  ;;  %v3940_v18 = vld [vmem:[%s5988_s5 + $0x4d4] sm:$0xf] }
  0x56   :  { %v3654_v63 = vld [vmem:[%s5988_s5 + $0x6ac] sm:$0xf0] }
  0x57   :  { %v2870_v17 = vld [vmem:[%s5988_s5 + $0x8c] sm:$0xf0] }
  0x58   :  { %641 = vmatpush.bf16.msra.mxu0 %v2601_v22  ;;  %v3880_v22 = vld [vmem:[%s5988_s5 + $0x2f0] sm:$0xf0] }
  0x59   :  { %654 = vmatpush.bf16.msra.mxu1 %v2729_v26  ;;  %v3653_v26 = vor.u32 %v3999_v16, %v3652_v13  ;;  %v3177_v32 = vor.u32 %v3880_v22, %v3176_v21  ;;  %v3964_v13 = vld [vmem:[%s5988_s5 + $0x590] sm:$0xf0]  ;;  %v2812_v21 = vld [vmem:[%s5988_s5] sm:$0xf]  ;;  %v3789_v22 = vld [vmem:[%s5988_s5 + $0x18] sm:$0xf0] }
  0x5a   :  { %v2813_v31 = vor.u32 %v3789_v22, %v2812_v21  ;;  %v3842_v22 = vld [vmem:[%s5988_s5 + $0x1c4] sm:$0xf] }
  0x5c   :  { %642 = vmatpush.bf16.msra.mxu0 %v2585_v37  ;;  %v3817_v37 = vld [vmem:[%s5988_s5 + $0xf8] sm:$0xf0] }
  0x5d   :  { %655 = vmatpush.bf16.msra.mxu1 %v2713_v38  ;;  %v3625_v38 = vor.u32 %v3992_v29, %v3624_v27  ;;  %v3010_v27 = vld [vmem:[%s5988_s5 + $0x1a4] sm:$0xf0]  ;;  %v3957_v29 = vld [vmem:[%s5988_s5 + $0x558] sm:$0xf0] }
  0x60   :  { %643 = vmatpush.bf16.msra.mxu0 %v2569_v47  ;;  %v2925_v47 = vor.u32 %v3817_v37, %v2924_v36  ;;  %v3206_v37 = vld [vmem:[%s5988_s5 + $0x32c] sm:$0xf0] }
  0x61   :  { %656 = vmatpush.bf16.msra.mxu1 %v2697_v48  ;;  %v2896_v48 = vld [vmem:[%s5988_s5 + $0xa8] sm:$0xf] }
  0x62   :  { %v2897_v59 = vor.u32 %v3810_v49, %v2896_v48  ;;  %v3870_v49 = vld [vmem:[%s5988_s5 + $0x2a4] sm:$0xf] }
  0xa0   :  { %v139_v52 = vpop.f32.mrf.mxu0 }
  0xa1   :  { %v140_v53 = vadd.f32 %v139_v52, %v46_v50  ;;  %v152_v54 = vpop.f32.mrf.mxu1  ;;  %v3597_v50 = vor.u32 %v3985_v41, %v3596_v39  ;;  %v3373_v52 = vor.u32 %v3929_v43, %v3372_v42  ;;  %v2982_v39 = vld [vmem:[%s5988_s5 + $0x16c] sm:$0xf0]  ;;  %v3877_v43 = vld [vmem:[%s5988_s5 + $0x2dc] sm:$0xf] }
  0xa2   :  { %v153_v58 = vadd.f32 %v152_v54, %v47_v51  ;;  %v3568_v51 = vld [vmem:[%s5988_s5 + $0x5e8] sm:$0xf]  ;;  %v3181_v48 = vor.u32 %v3877_v43, %v3178_v45  ;;  %v3968_v43 = vld [vmem:[%s5988_s5 + $0x5b4] sm:$0xf] }
  0xa3   :  { %vm156_vm0 = vcmp.gt.f32.partialorder %v140_v53, 0.0  ;;  %v158_v62 = vmul.f32 0.2, %v140_v53  ;;  %v3344_v54 = vld [vmem:[%s5988_s5 + $0x428] sm:$0xf] }
  0xa4   :  { %vm157_vm1 = vcmp.gt.f32.partialorder %v153_v58, 0.0  ;;  %v159_v0 = vmul.f32 0.2, %v153_v58 }
  0xa5   :  { %v160_v2 = vsel %vm156_vm0, %v140_v53, %v158_v62  ;;  %v3978_v53 = vld [vmem:[%s5988_s5 + $0x600] sm:$0xf0] }
  0xa6   :  { %v4588_v3 = vpack.c.bf16 %v160_v2, %v160_v2  ;;  %v161_v4 = vsel %vm157_vm1, %v153_v58, %v159_v0  ;;  %v3859_v58 = vld [vmem:[%s5988_s5 + $0x248] sm:$0xf0]  ;;  %v3569_v62 = vor.u32 %v3978_v53, %v3568_v51  ;;  %v3345_v0 = vor.u32 %v3922_v55, %v3344_v54  ;;  %v3316_v2 = vld [vmem:[%s5988_s5 + $0x3f0] sm:$0xf]  ;;  %v3150_v51 = vld [vmem:[%s5988_s5 + $0x2bc] sm:$0xf0] }
  0xa7   :  { %v4596_v9 = vpack.c.bf16 %v161_v4, %v161_v4  ;;  %v3915_v4 = vld [vmem:[%s5988_s5 + $0x408] sm:$0xf0]  ;;  %v2926_v53 = vld [vmem:[%s5988_s5 + $0xfc] sm:$0xf0]  ;;  %v3153_v54 = vor.u32 %v3870_v49, %v3150_v51  ;;  %v3961_v49 = vld [vmem:[%s5988_s5 + $0x57c] sm:$0xf] }
  0xa8   :  { %v141_v15 = vpop.f32.mrf.mxu0  ;;  %566 = vmatmul.bf16.vlgmr.msra.gmra.mxu2 %v4588_v3  ;;  %592 = vmatmul.bf16.vlgmr.msrb.gmra.mxu0 %v4588_v3 }
  0xa9   :  { %v154_v19 = vpop.f32.mrf.mxu1  ;;  %579 = vmatmul.bf16.vlgmr.msra.gmra.mxu3 %v4596_v9  ;;  %605 = vmatmul.bf16.vlgmr.msrb.gmra.mxu1 %v4596_v9  ;;  %v3908_v15 = vld [vmem:[%s5988_s5 + $0x3d0] sm:$0xf0] }
  0xaa   :  { %2115 = vmatpush.bf16.msra.mxu3 %v3233_v5  ;;  %2102 = vmatpush.bf16.msra.mxu2 %v3009_v8  ;;  %v3093_v5 = vor.u32 %v3859_v58, %v3092_v57  ;;  %v2840_v8 = vld [vmem:[%s5988_s5 + $0x38] sm:$0xf]  ;;  %v3122_v57 = vld [vmem:[%s5988_s5 + $0x284] sm:$0xf0] }
  0xab   :  { %2141 = vmatpush.bf16.msrb.mxu1 %v3681_v12  ;;  %2128 = vmatpush.bf16.msrb.mxu0 %v3457_v14  ;;  %v3317_v12 = vor.u32 %v3915_v4, %v3316_v2  ;;  %v3288_v14 = vld [vmem:[%s5988_s5 + $0x3b8] sm:$0xf]  ;;  %v3657_v2 = vor.u32 %v3996_v61, %v3654_v63  ;;  %v3898_v63 = vld [vmem:[%s5988_s5 + $0x384] sm:$0xf] }
  0xac   :  { %v3289_v24 = vor.u32 %v3908_v15, %v3288_v14  ;;  %v3626_v14 = vld [vmem:[%s5988_s5 + $0x674] sm:$0xf0] }
  0xae   :  { %2116 = vmatpush.bf16.msra.mxu3 %v3205_v20  ;;  %2103 = vmatpush.bf16.msra.mxu2 %v2981_v23  ;;  %v3891_v20 = vld [vmem:[%s5988_s5 + $0x34c] sm:$0xf]  ;;  %v3513_v23 = vor.u32 %v3964_v13, %v3512_v11  ;;  %v3066_v11 = vld [vmem:[%s5988_s5 + $0x214] sm:$0xf0] }
  0xaf   :  { %2142 = vmatpush.bf16.msrb.mxu1 %v3653_v26  ;;  %2129 = vmatpush.bf16.msrb.mxu0 %v3429_v28  ;;  %v3835_v26 = vld [vmem:[%s5988_s5 + $0x18c] sm:$0xf]  ;;  %v3484_v28 = vld [vmem:[%s5988_s5 + $0x540] sm:$0xf]  ;;  %v3237_v34 = vor.u32 %v3891_v20, %v3234_v25  ;;  %v3430_v20 = vld [vmem:[%s5988_s5 + $0x4ec] sm:$0xf0] }
  0xb0   :  { %v3013_v36 = vor.u32 %v3835_v26, %v3010_v27  ;;  %v3433_v21 = vor.u32 %v3940_v18, %v3430_v20  ;;  %v3598_v26 = vld [vmem:[%s5988_s5 + $0x63c] sm:$0xf0]  ;;  %v3888_v18 = vld [vmem:[%s5988_s5 + $0x330] sm:$0xf0] }
  0xb2   :  { %2117 = vmatpush.bf16.msra.mxu3 %v3177_v32  ;;  %2104 = vmatpush.bf16.msra.mxu2 %v2953_v35  ;;  %v4003_v32 = vld [vmem:[%s5988_s5 + $0x6cc] sm:$0xf]  ;;  %v3884_v35 = vld [vmem:[%s5988_s5 + $0x314] sm:$0xf] }
  0xb3   :  { %2143 = vmatpush.bf16.msrb.mxu1 %v3625_v38  ;;  %2130 = vmatpush.bf16.msrb.mxu0 %v3401_v40  ;;  %v3828_v38 = vld [vmem:[%s5988_s5 + $0x154] sm:$0xf]  ;;  %v3485_v40 = vor.u32 %v3957_v29, %v3484_v28  ;;  %v3685_v41 = vor.u32 %v4003_v32, %v3682_v33  ;;  %v3209_v42 = vor.u32 %v3884_v35, %v3206_v37  ;;  %v3793_v28 = vld [vmem:[%s5988_s5 + $0x3c] sm:$0xf]  ;;  %v2842_v29 = vld [vmem:[%s5988_s5 + $0x54] sm:$0xf0] }
  0xb4   :  { %v3402_v32 = vld [vmem:[%s5988_s5 + $0x4b4] sm:$0xf0]  ;;  %v3570_v35 = vld [vmem:[%s5988_s5 + $0x604] sm:$0xf0]  ;;  %v3786_v37 = vld [vmem:[%s5988_s5 + $0x4] sm:$0xf] }
  0xb6   :  { %2118 = vmatpush.bf16.msra.mxu3 %v3149_v44  ;;  %2105 = vmatpush.bf16.msra.mxu2 %v2925_v47  ;;  %v2985_v44 = vor.u32 %v3828_v38, %v2982_v39  ;;  %v2954_v47 = vld [vmem:[%s5988_s5 + $0x134] sm:$0xf0]  ;;  %v2814_v38 = vld [vmem:[%s5988_s5 + $0x1c] sm:$0xf0]  ;;  %v3926_v39 = vld [vmem:[%s5988_s5 + $0x464] sm:$0xf] }
  0xb7   :  { %2144 = vmatpush.bf16.msrb.mxu1 %v3597_v50  ;;  %2131 = vmatpush.bf16.msrb.mxu0 %v3373_v52  ;;  %v2957_v50 = vor.u32 %v3821_v46, %v2954_v47  ;;  %v3814_v52 = vld [vmem:[%s5988_s5 + $0xe4] sm:$0xf]  ;;  %v3919_v46 = vld [vmem:[%s5988_s5 + $0x42c] sm:$0xf]  ;;  %v3346_v47 = vld [vmem:[%s5988_s5 + $0x444] sm:$0xf0] }
  0xb8   :  { %618 = vmatmul.bf16.vlgmr.msrb.gmra.mxu2 %v4588_v3  ;;  %644 = vmatmul.bf16.vlgmr.msra.gmra.mxu0 %v4588_v3  ;;  %v3064_v3 = vld [vmem:[%s5988_s5 + $0x1f8] sm:$0xf]  ;;  %v2929_v55 = vor.u32 %v3814_v52, %v2926_v53  ;;  %v3912_v52 = vld [vmem:[%s5988_s5 + $0x3f4] sm:$0xf]  ;;  %v3318_v53 = vld [vmem:[%s5988_s5 + $0x40c] sm:$0xf0] }
  0xb9   :  { %631 = vmatmul.bf16.vlgmr.msrb.gmra.mxu3 %v4596_v9  ;;  %657 = vmatmul.bf16.vlgmr.msra.gmra.mxu1 %v4596_v9  ;;  %v3796_v9 = vld [vmem:[%s5988_s5 + $0x50] sm:$0xf0]  ;;  %v3065_v16 = vor.u32 %v3852_v6, %v3064_v3  ;;  %v2898_v3 = vld [vmem:[%s5988_s5 + $0xc4] sm:$0xf0]  ;;  %v3947_v6 = vld [vmem:[%s5988_s5 + $0x50c] sm:$0xf] }
  0xba   :  { %2119 = vmatpush.bf16.msra.mxu3 %v3121_v56  ;;  %2106 = vmatpush.bf16.msra.mxu2 %v2897_v59  ;;  %v2841_v19 = vor.u32 %v3796_v9, %v2840_v8  ;;  %v3863_v56 = vld [vmem:[%s5988_s5 + $0x26c] sm:$0xf]  ;;  %v3856_v59 = vld [vmem:[%s5988_s5 + $0x234] sm:$0xf]  ;;  %v3458_v8 = vld [vmem:[%s5988_s5 + $0x524] sm:$0xf0] }
  0xbb   :  { %2145 = vmatpush.bf16.msrb.mxu1 %v3569_v62  ;;  %2132 = vmatpush.bf16.msrb.mxu0 %v3345_v0  ;;  %v3125_v58 = vor.u32 %v3863_v56, %v3122_v57  ;;  %v3097_v62 = vor.u32 %v3856_v59, %v3094_v60  ;;  %v3260_v0 = vld [vmem:[%s5988_s5 + $0x380] sm:$0xf]  ;;  %v3461_v9 = vor.u32 %v3947_v6, %v3458_v8  ;;  %v3290_v59 = vld [vmem:[%s5988_s5 + $0x3d4] sm:$0xf0]  ;;  %v3895_v8 = vld [vmem:[%s5988_s5 + $0x368] sm:$0xf0] }
  0xbc   :  { %v3261_v4 = vor.u32 %v3901_v1, %v3260_v0  ;;  %v3486_v56 = vld [vmem:[%s5988_s5 + $0x55c] sm:$0xf0] }
  0xbd   :  { %v4957_v60 = vld [vmem:[%s5987_s4] sm:$0xf] }
  0xbe   :  { %2120 = vmatpush.bf16.msra.mxu3 %v3093_v5  ;;  %2107 = vmatpush.bf16.msra.mxu2 %v2869_v7  ;;  %v3807_v5 = vld [vmem:[%s5988_s5 + $0xac] sm:$0xf]  ;;  %v3262_v0 = vld [vmem:[%s5988_s5 + $0x39c] sm:$0xf0]  ;;  %v230_v6 = vperm.slane %v4957_v60, 0 }
  0xbf   :  { %2146 = vmatpush.bf16.msrb.mxu1 %v3541_v10  ;;  %2133 = vmatpush.bf16.msrb.mxu0 %v3317_v12  ;;  %v2901_v7 = vor.u32 %v3807_v5, %v2898_v3  ;;  %v3849_v10 = vld [vmem:[%s5988_s5 + $0x1fc] sm:$0xf]  ;;  %v3265_v1 = vor.u32 %v3898_v63, %v3262_v0  ;;  %v3860_v0 = vld [vmem:[%s5988_s5 + $0x250] sm:$0xf0] }
  0xc0   :  { %v3989_v12 = vld [vmem:[%s5988_s5 + $0x65c] sm:$0xf]  ;;  %v3069_v13 = vor.u32 %v3849_v10, %v3066_v11 }
  0xc1   :  { %v3629_v15 = vor.u32 %v3989_v12, %v3626_v14 }
  0xc2   :  { %2121 = vmatpush.bf16.msra.mxu3 %v3065_v16  ;;  %2108 = vmatpush.bf16.msra.mxu2 %v2841_v19  ;;  %v3800_v16 = vld [vmem:[%s5988_s5 + $0x74] sm:$0xf] }
  0xc3   :  { %2147 = vmatpush.bf16.msrb.mxu1 %v3513_v23  ;;  %2134 = vmatpush.bf16.msrb.mxu0 %v3289_v24  ;;  %v2873_v19 = vor.u32 %v3800_v16, %v2870_v17  ;;  %v3038_v23 = vld [vmem:[%s5988_s5 + $0x1dc] sm:$0xf0]  ;;  %v3982_v24 = vld [vmem:[%s5988_s5 + $0x624] sm:$0xf]  ;;  %v3212_v17 = vld [vmem:[%s5988_s5 + $0x318] sm:$0xf] }
  0xc4   :  { %v3041_v25 = vor.u32 %v3842_v22, %v3038_v23  ;;  %v3601_v27 = vor.u32 %v3982_v24, %v3598_v26  ;;  %v3839_v22 = vld [vmem:[%s5988_s5 + $0x1a8] sm:$0xf0]  ;;  %v3213_v24 = vor.u32 %v3888_v18, %v3212_v17  ;;  %v3881_v26 = vld [vmem:[%s5988_s5 + $0x2f8] sm:$0xf0] }
  0xc5   :  { %v3993_v17 = vld [vmem:[%s5988_s5 + $0x678] sm:$0xf0] }
  0xc6   :  { %2122 = vmatpush.bf16.msra.mxu3 %v3037_v30  ;;  %2109 = vmatpush.bf16.msra.mxu2 %v2813_v31  ;;  %v3933_v30 = vld [vmem:[%s5988_s5 + $0x49c] sm:$0xf]  ;;  %v2845_v31 = vor.u32 %v3793_v28, %v2842_v29  ;;  %v233_v28 = vperm.slane %v4957_v60, 3 }
  0xc7   :  { %2148 = vmatpush.bf16.msrb.mxu1 %v3485_v40  ;;  %2135 = vmatpush.bf16.msrb.mxu0 %v3261_v4  ;;  %v3405_v33 = vor.u32 %v3933_v30, %v3402_v32  ;;  %v2817_v40 = vor.u32 %v3786_v37, %v2814_v38  ;;  %v2988_v32 = vld [vmem:[%s5988_s5 + $0x158] sm:$0xf]  ;;  %v3156_v37 = vld [vmem:[%s5988_s5 + $0x2a8] sm:$0xf]  ;;  %v3874_v38 = vld [vmem:[%s5988_s5 + $0x2c0] sm:$0xf0] }
  0xca   :  { %2167 = vmatpush.bf16.msrb.mxu3 %v3237_v34  ;;  %2154 = vmatpush.bf16.msrb.mxu2 %v3013_v36  ;;  %v3975_v34 = vld [vmem:[%s5988_s5 + $0x5ec] sm:$0xf] }
  0xcb   :  { %2193 = vmatpush.bf16.msra.mxu1 %v3685_v41  ;;  %2180 = vmatpush.bf16.msra.mxu0 %v3461_v9  ;;  %v3573_v36 = vor.u32 %v3975_v34, %v3570_v35  ;;  %v3374_v41 = vld [vmem:[%s5988_s5 + $0x47c] sm:$0xf0] }
  0xce   :  { %2168 = vmatpush.bf16.msrb.mxu3 %v3209_v42  ;;  %2155 = vmatpush.bf16.msrb.mxu2 %v2985_v44  ;;  %v3377_v42 = vor.u32 %v3926_v39, %v3374_v41  ;;  %v3542_v44 = vld [vmem:[%s5988_s5 + $0x5cc] sm:$0xf0] }
  0xcf   :  { %2194 = vmatpush.bf16.msra.mxu1 %v3657_v2  ;;  %2181 = vmatpush.bf16.msra.mxu0 %v3433_v21  ;;  %v3545_v45 = vor.u32 %v3968_v43, %v3542_v44  ;;  %v3016_v21 = vld [vmem:[%s5988_s5 + $0x190] sm:$0xf]  ;;  %v3825_v43 = vld [vmem:[%s5988_s5 + $0x138] sm:$0xf0] }
  0xd0   :  { %v3017_v29 = vor.u32 %v3839_v22, %v3016_v21  ;;  %v2876_v21 = vld [vmem:[%s5988_s5 + $0x78] sm:$0xf] }
  0xd2   :  { %2169 = vmatpush.bf16.msrb.mxu3 %v3181_v48  ;;  %2156 = vmatpush.bf16.msrb.mxu2 %v2957_v50  ;;  %v3349_v48 = vor.u32 %v3919_v46, %v3346_v47  ;;  %v3514_v50 = vld [vmem:[%s5988_s5 + $0x594] sm:$0xf0]  ;;  %v3157_v46 = vor.u32 %v3874_v38, %v3156_v37  ;;  %v3128_v47 = vld [vmem:[%s5988_s5 + $0x270] sm:$0xf]  ;;  %v3892_v37 = vld [vmem:[%s5988_s5 + $0x354] sm:$0xf] }
  0xd3   :  { %2195 = vmatpush.bf16.msra.mxu1 %v3629_v15  ;;  %2182 = vmatpush.bf16.msra.mxu0 %v3405_v33  ;;  %v3517_v51 = vor.u32 %v3961_v49, %v3514_v50  ;;  %v3832_v33 = vld [vmem:[%s5988_s5 + $0x170] sm:$0xf0]  ;;  %v3688_v49 = vld [vmem:[%s5988_s5 + $0x6d0] sm:$0xf]  ;;  %v4007_v50 = vld [vmem:[%s5988_s5 + $0x6e8] sm:$0xf0] }
  0xd4   :  { %v2989_v41 = vor.u32 %v3832_v33, %v2988_v32  ;;  %v3846_v32 = vld [vmem:[%s5988_s5 + $0x1e0] sm:$0xf0]  ;;  %v3604_v33 = vld [vmem:[%s5988_s5 + $0x628] sm:$0xf]  ;;  %v3242_v38 = vld [vmem:[%s5988_s5 + $0x36c] sm:$0xf0] }
  0xd6   :  { %2170 = vmatpush.bf16.msrb.mxu3 %v3153_v54  ;;  %2157 = vmatpush.bf16.msrb.mxu2 %v2929_v55  ;;  %v3321_v54 = vor.u32 %v3912_v52, %v3318_v53  ;;  %v3954_v55 = vld [vmem:[%s5988_s5 + $0x544] sm:$0xf] }
  0xd7   :  { %2196 = vmatpush.bf16.msra.mxu1 %v3601_v27  ;;  %2183 = vmatpush.bf16.msra.mxu0 %v3377_v42  ;;  %v3489_v57 = vor.u32 %v3954_v55, %v3486_v56  ;;  %v2960_v42 = vld [vmem:[%s5988_s5 + $0x120] sm:$0xf]  ;;  %v3818_v55 = vld [vmem:[%s5988_s5 + $0x100] sm:$0xf0] }
  0xd8   :  { %v2961_v52 = vor.u32 %v3825_v43, %v2960_v42  ;;  %v3937_v42 = vld [vmem:[%s5988_s5 + $0x4b8] sm:$0xf0] }
  0xda   :  { %2171 = vmatpush.bf16.msrb.mxu3 %v3125_v58  ;;  %2158 = vmatpush.bf16.msrb.mxu2 %v2901_v7  ;;  %v3905_v58 = vld [vmem:[%s5988_s5 + $0x3bc] sm:$0xf]  ;;  %v3240_v7 = vld [vmem:[%s5988_s5 + $0x350] sm:$0xf] }
  0xdb   :  { %2197 = vmatpush.bf16.msra.mxu1 %v3573_v36  ;;  %2184 = vmatpush.bf16.msra.mxu0 %v3349_v48  ;;  %v3293_v61 = vor.u32 %v3905_v58, %v3290_v59  ;;  %v3241_v14 = vor.u32 %v3895_v8, %v3240_v7  ;;  %v3867_v48 = vld [vmem:[%s5988_s5 + $0x288] sm:$0xf0]  ;;  %v3464_v8 = vld [vmem:[%s5988_s5 + $0x510] sm:$0xf] }
  0xdc   :  { %v3129_v59 = vor.u32 %v3867_v48, %v3128_v47  ;;  %v3811_v7 = vld [vmem:[%s5988_s5 + $0xc8] sm:$0xf0] }
  0xdd   :  { %v3979_v47 = vld [vmem:[%s5988_s5 + $0x608] sm:$0xf0] }
  0xde   :  { %2172 = vmatpush.bf16.msrb.mxu3 %v3097_v62  ;;  %2159 = vmatpush.bf16.msrb.mxu2 %v2873_v19  ;;  %v231_v62 = vperm.slane %v4957_v60, 1 }
  0xdf   :  { %2198 = vmatpush.bf16.msra.mxu1 %v3545_v45  ;;  %2185 = vmatpush.bf16.msra.mxu0 %v3321_v54  ;;  %v232_v45 = vperm.slane %v4957_v60, 2  ;;  %v2932_v54 = vld [vmem:[%s5988_s5 + $0xe8] sm:$0xf]  ;;  %v3689_v60 = vor.u32 %v4007_v50, %v3688_v49  ;;  %v3885_v50 = vld [vmem:[%s5988_s5 + $0x31c] sm:$0xf] }
  0xe2   :  { %2173 = vmatpush.bf16.msrb.mxu3 %v3069_v13  ;;  %2160 = vmatpush.bf16.msrb.mxu2 %v2845_v31 }
  0xe3   :  { %2199 = vmatpush.bf16.msra.mxu1 %v3517_v51  ;;  %2186 = vmatpush.bf16.msra.mxu0 %v3293_v61  ;;  %v3100_v61 = vld [vmem:[%s5988_s5 + $0x238] sm:$0xf] }
  0xe6   :  { %2174 = vmatpush.bf16.msrb.mxu3 %v3041_v25  ;;  %2161 = vmatpush.bf16.msrb.mxu2 %v2817_v40  ;;  %v3184_v25 = vld [vmem:[%s5988_s5 + $0x2e0] sm:$0xf] }
  0xe7   :  { %2200 = vmatpush.bf16.msra.mxu1 %v3489_v57  ;;  %2187 = vmatpush.bf16.msra.mxu0 %v3265_v1  ;;  %v3185_v35 = vor.u32 %v3881_v26, %v3184_v25  ;;  %v3660_v1 = vld [vmem:[%s5988_s5 + $0x698] sm:$0xf]  ;;  %v3944_v26 = vld [vmem:[%s5988_s5 + $0x4f0] sm:$0xf0] }
  0xe8   :  { %v3436_v25 = vld [vmem:[%s5988_s5 + $0x4d8] sm:$0xf] }
 0x125   :  { %v593_v2 = vpop.f32.mrf.mxu0 }
 0x126   :  { %v594_v4 = vadd.f32 %v593_v2, %v231_v62  ;;  %v606_v5 = vpop.f32.mrf.mxu1  ;;  %v4000_v2 = vld [vmem:[%s5988_s5 + $0x6b0] sm:$0xf0] }
 0x128   :  { %v607_v3 = vadd.f32 %v606_v5, %v594_v4 }
 0x12a   :  { %vm663_vm2 = vcmp.gt.f32.partialorder %v607_v3, 0.0  ;;  %v667_v9 = vmul.f32 0.2, %v607_v3 }
 0x12b   :  { %v567_v10 = vpop.f32.mrf.mxu2 }
 0x12c   :  { %v671_v11 = vsel %vm663_vm2, %v607_v3, %v667_v9  ;;  %v568_v12 = vadd.f32 %v567_v10, %v230_v6  ;;  %v580_v13 = vpop.f32.mrf.mxu3  ;;  %v2933_v3 = vor.u32 %v3818_v55, %v2932_v54  ;;  %v2904_v6 = vld [vmem:[%s5988_s5 + $0xb0] sm:$0xf]  ;;  %v3951_v9 = vld [vmem:[%s5988_s5 + $0x528] sm:$0xf0]  ;;  %v3380_v54 = vld [vmem:[%s5988_s5 + $0x468] sm:$0xf] }
 0x12d   :  { %v4973_v15 = vpack.c.bf16 %v671_v11, %v671_v11  ;;  %v595_v16 = vpop.f32.mrf.mxu0  ;;  %v3101_v11 = vor.u32 %v3860_v0, %v3100_v61  ;;  %v3930_v55 = vld [vmem:[%s5988_s5 + $0x480] sm:$0xf0]  ;;  %v3972_v61 = vld [vmem:[%s5988_s5 + $0x5d0] sm:$0xf0] }
 0x12e   :  { %v581_v19 = vadd.f32 %v580_v13, %v568_v12  ;;  %v608_v20 = vpop.f32.mrf.mxu1  ;;  %v3661_v12 = vor.u32 %v4000_v2, %v3660_v1  ;;  %v3072_v13 = vld [vmem:[%s5988_s5 + $0x200] sm:$0xf]  ;;  %v3381_v0 = vor.u32 %v3930_v55, %v3380_v54  ;;  %v3878_v1 = vld [vmem:[%s5988_s5 + $0x2e4] sm:$0xf] }
 0x12f   :  { %2123 = vmatmul.bf16.vlgmr.msra.gmra.mxu3 %v4973_v15  ;;  %v3632_v16 = vld [vmem:[%s5988_s5 + $0x660] sm:$0xf]  ;;  %v3465_v20 = vor.u32 %v3951_v9, %v3464_v8  ;;  %v2990_v8 = vld [vmem:[%s5988_s5 + $0x174] sm:$0xf0]  ;;  %v3850_v54 = vld [vmem:[%s5988_s5 + $0x204] sm:$0xf] }
 0x130   :  { %vm662_vm3 = vcmp.gt.f32.partialorder %v581_v19, 0.0  ;;  %v666_v23 = vmul.f32 0.2, %v581_v19  ;;  %2219 = vmatpush.bf16.msra.mxu3 %v3241_v14  ;;  %v3853_v14 = vld [vmem:[%s5988_s5 + $0x218] sm:$0xf0] }
 0x131   :  { %v3186_v2 = vld [vmem:[%s5988_s5 + $0x2fc] sm:$0xf0] }
 0x132   :  { %v670_v27 = vsel %vm662_vm3, %v581_v19, %v666_v23  ;;  %v2905_v19 = vor.u32 %v3811_v7, %v2904_v6  ;;  %v3829_v7 = vld [vmem:[%s5988_s5 + $0x15c] sm:$0xf]  ;;  %v3189_v9 = vor.u32 %v3878_v1, %v3186_v2  ;;  %v3438_v1 = vld [vmem:[%s5988_s5 + $0x4f4] sm:$0xf0] }
 0x133   :  { %v4995_v30 = vpack.c.bf16 %v670_v27, %v670_v27  ;;  %v569_v31 = vpop.f32.mrf.mxu2 }
 0x134   :  { %v582_v34 = vpop.f32.mrf.mxu3  ;;  %2220 = vmatpush.bf16.msra.mxu3 %v3213_v24  ;;  %v3804_v24 = vld [vmem:[%s5988_s5 + $0x90] sm:$0xf0]  ;;  %v3044_v31 = vld [vmem:[%s5988_s5 + $0x1c8] sm:$0xf] }
 0x135   :  { %v645_v36 = vpop.f32.mrf.mxu0  ;;  %2110 = vmatmul.bf16.vlgmr.msra.gmra.mxu2 %v4995_v30  ;;  %v3986_v34 = vld [vmem:[%s5988_s5 + $0x640] sm:$0xf0]  ;;  %v3045_v43 = vor.u32 %v3846_v32, %v3044_v31  ;;  %v3690_v31 = vld [vmem:[%s5988_s5 + $0x6ec] sm:$0xf0] }
 0x136   :  { %v646_v39 = vadd.f32 %v645_v36, %v233_v28  ;;  %v658_v40 = vpop.f32.mrf.mxu1  ;;  %2206 = vmatpush.bf16.msra.mxu2 %v3017_v29  ;;  %v3073_v28 = vor.u32 %v3853_v14, %v3072_v13  ;;  %v3633_v29 = vor.u32 %v3993_v17, %v3632_v16  ;;  %v3437_v36 = vor.u32 %v3944_v26, %v3436_v25  ;;  %v3871_v13 = vld [vmem:[%s5988_s5 + $0x2ac] sm:$0xf]  ;;  %v3158_v14 = vld [vmem:[%s5988_s5 + $0x2c4] sm:$0xf0]  ;;  %v3324_v17 = vld [vmem:[%s5988_s5 + $0x3f8] sm:$0xf] }
 0x137   :  { %v2993_v16 = vor.u32 %v3829_v7, %v2990_v8  ;;  %v3958_v25 = vld [vmem:[%s5988_s5 + $0x560] sm:$0xf0]  ;;  %v3864_v26 = vld [vmem:[%s5988_s5 + $0x274] sm:$0xf]  ;;  %v3606_v7 = vld [vmem:[%s5988_s5 + $0x644] sm:$0xf0] }
 0x138   :  { %v659_v44 = vadd.f32 %v658_v40, %v646_v39  ;;  %2221 = vmatpush.bf16.msra.mxu3 %v3185_v35  ;;  %v2877_v35 = vor.u32 %v3804_v24, %v2876_v21  ;;  %v2848_v39 = vld [vmem:[%s5988_s5 + $0x40] sm:$0xf]  ;;  %v3797_v40 = vld [vmem:[%s5988_s5 + $0x58] sm:$0xf0]  ;;  %v3492_v24 = vld [vmem:[%s5988_s5 + $0x548] sm:$0xf] }
 0x139   :  { %v2849_v48 = vor.u32 %v3797_v40, %v2848_v39  ;;  %v2962_v21 = vld [vmem:[%s5988_s5 + $0x13c] sm:$0xf0]  ;;  %v3857_v40 = vld [vmem:[%s5988_s5 + $0x23c] sm:$0xf] }
 0x13a   :  { %vm665_vm4 = vcmp.gt.f32.partialorder %v659_v44, 0.0  ;;  %v669_v51 = vmul.f32 0.2, %v659_v44  ;;  %2207 = vmatpush.bf16.msra.mxu2 %v2989_v41  ;;  %v3408_v41 = vld [vmem:[%s5988_s5 + $0x4a0] sm:$0xf] }
 0x13b   :  { %v619_v53 = vpop.f32.mrf.mxu2  ;;  %v3409_v49 = vor.u32 %v3937_v42, %v3408_v41  ;;  %v3102_v42 = vld [vmem:[%s5988_s5 + $0x254] sm:$0xf0] }
 0x13c   :  { %v673_v56 = vsel %vm665_vm4, %v659_v44, %v669_v51  ;;  %v620_v57 = vadd.f32 %v619_v53, %v232_v45  ;;  %v632_v58 = vpop.f32.mrf.mxu3  ;;  %2222 = vmatpush.bf16.msra.mxu3 %v3157_v46  ;;  %v3605_v44 = vor.u32 %v3986_v34, %v3604_v33  ;;  %v3245_v45 = vor.u32 %v3892_v37, %v3242_v38  ;;  %v3576_v46 = vld [vmem:[%s5988_s5 + $0x5f0] sm:$0xf]  ;;  %v3214_v51 = vld [vmem:[%s5988_s5 + $0x334] sm:$0xf0]  ;;  %v3790_v53 = vld [vmem:[%s5988_s5 + $0x20] sm:$0xf0] }
 0x13d   :  { %v5038_v62 = vpack.c.bf16 %v673_v56, %v673_v56  ;;  %v647_v63 = vpop.f32.mrf.mxu0  ;;  %v3577_v56 = vor.u32 %v3979_v47, %v3576_v46  ;;  %v3296_v33 = vld [vmem:[%s5988_s5 + $0x3c0] sm:$0xf]  ;;  %v3909_v34 = vld [vmem:[%s5988_s5 + $0x3d8] sm:$0xf0]  ;;  %v2934_v37 = vld [vmem:[%s5988_s5 + $0x104] sm:$0xf0] }
 0x13e   :  { %v633_v4 = vadd.f32 %v632_v58, %v620_v57  ;;  %v660_v5 = vpop.f32.mrf.mxu1  ;;  %2208 = vmatpush.bf16.msra.mxu2 %v2961_v52  ;;  %v2820_v52 = vld [vmem:[%s5988_s5 + $0x8] sm:$0xf]  ;;  %v3836_v57 = vld [vmem:[%s5988_s5 + $0x194] sm:$0xf]  ;;  %v3018_v58 = vld [vmem:[%s5988_s5 + $0x1ac] sm:$0xf0]  ;;  %v3297_v41 = vor.u32 %v3909_v34, %v3296_v33 }
 0x13f   :  { %2149 = vmatmul.bf16.vlgmr.msrb.gmra.mxu1 %v5038_v62  ;;  %2175 = vmatmul.bf16.vlgmr.msrb.gmra.mxu3 %v4973_v15  ;;  %v2821_v63 = vor.u32 %v3790_v53, %v2820_v52  ;;  %v3352_v5 = vld [vmem:[%s5988_s5 + $0x430] sm:$0xf]  ;;  %v3268_v46 = vld [vmem:[%s5988_s5 + $0x388] sm:$0xf]  ;;  %v3902_v47 = vld [vmem:[%s5988_s5 + $0x3a0] sm:$0xf0]  ;;  %v3105_v52 = vor.u32 %v3857_v40, %v3102_v42 }
 0x140   :  { %vm664_vm5 = vcmp.gt.f32.partialorder %v633_v4, 0.0  ;;  %v668_v10 = vmul.f32 0.2, %v633_v4  ;;  %2223 = vmatpush.bf16.msra.mxu3 %v3129_v59  ;;  %2245 = vmatpush.bf16.msrb.mxu1 %v3689_v60  ;;  %v3217_v59 = vor.u32 %v3885_v50, %v3214_v51  ;;  %v3548_v60 = vld [vmem:[%s5988_s5 + $0x5b8] sm:$0xf]  ;;  %v3269_v55 = vor.u32 %v3902_v47, %v3268_v46 }
 0x141   :  { %v3549_v6 = vor.u32 %v3972_v61, %v3548_v60  ;;  %v3948_v50 = vld [vmem:[%s5988_s5 + $0x514] sm:$0xf]  ;;  %v3466_v51 = vld [vmem:[%s5988_s5 + $0x52c] sm:$0xf0]  ;;  %v3801_v61 = vld [vmem:[%s5988_s5 + $0x7c] sm:$0xf] }
 0x142   :  { %v672_v18 = vsel %vm664_vm5, %v633_v4, %v668_v10  ;;  %2209 = vmatpush.bf16.msra.mxu2 %v2933_v3  ;;  %v3021_v4 = vor.u32 %v3836_v57, %v3018_v58  ;;  %v3923_v3 = vld [vmem:[%s5988_s5 + $0x448] sm:$0xf0]  ;;  %v3520_v10 = vld [vmem:[%s5988_s5 + $0x580] sm:$0xf]  ;;  %v3990_v57 = vld [vmem:[%s5988_s5 + $0x664] sm:$0xf]  ;;  %v3469_v60 = vor.u32 %v3948_v50, %v3466_v51 }
 0x143   :  { %v5078_v22 = vpack.c.bf16 %v672_v18, %v672_v18  ;;  %v621_v23 = vpop.f32.mrf.mxu2  ;;  %v3916_v18 = vld [vmem:[%s5988_s5 + $0x410] sm:$0xf0]  ;;  %v3634_v58 = vld [vmem:[%s5988_s5 + $0x67c] sm:$0xf0]  ;;  %v3024_v33 = vld [vmem:[%s5988_s5 + $0x198] sm:$0xf] }
 0x144   :  { %v634_v27 = vpop.f32.mrf.mxu3  ;;  %2224 = vmatpush.bf16.msra.mxu3 %v3101_v11  ;;  %2246 = vmatpush.bf16.msrb.mxu1 %v3661_v12  ;;  %v3965_v11 = vld [vmem:[%s5988_s5 + $0x598] sm:$0xf0]  ;;  %v3353_v12 = vor.u32 %v3923_v3, %v3352_v5  ;;  %v3161_v23 = vor.u32 %v3871_v13, %v3158_v14  ;;  %v3843_v5 = vld [vmem:[%s5988_s5 + $0x1cc] sm:$0xf]  ;;  %v3046_v3 = vld [vmem:[%s5988_s5 + $0x1e4] sm:$0xf0] }
 0x145   :  { %2136 = vmatmul.bf16.vlgmr.msrb.gmra.mxu0 %v5078_v22  ;;  %2162 = vmatmul.bf16.vlgmr.msrb.gmra.mxu2 %v4995_v30  ;;  %v3325_v27 = vor.u32 %v3916_v18, %v3324_v17  ;;  %v2850_v13 = vld [vmem:[%s5988_s5 + $0x5c] sm:$0xf0]  ;;  %v3934_v14 = vld [vmem:[%s5988_s5 + $0x4a4] sm:$0xf]  ;;  %v3049_v17 = vor.u32 %v3843_v5, %v3046_v3  ;;  %v3840_v34 = vld [vmem:[%s5988_s5 + $0x1b0] sm:$0xf0] }
 0x146   :  { %2210 = vmatpush.bf16.msra.mxu2 %v2905_v19  ;;  %2232 = vmatpush.bf16.msrb.mxu0 %v3465_v20  ;;  %v3521_v19 = vor.u32 %v3965_v11, %v3520_v10  ;;  %v3822_v20 = vld [vmem:[%s5988_s5 + $0x124] sm:$0xf]  ;;  %v3248_v10 = vld [vmem:[%s5988_s5 + $0x358] sm:$0xf]  ;;  %v3896_v11 = vld [vmem:[%s5988_s5 + $0x370] sm:$0xf0]  ;;  %v3025_v42 = vor.u32 %v3840_v34, %v3024_v33 }
 0x147   :  { %v2965_v32 = vor.u32 %v3822_v20, %v2962_v21  ;;  %v3976_v20 = vld [vmem:[%s5988_s5 + $0x5f4] sm:$0xf]  ;;  %v3578_v21 = vld [vmem:[%s5988_s5 + $0x60c] sm:$0xf0]  ;;  %v3192_v40 = vld [vmem:[%s5988_s5 + $0x2e8] sm:$0xf] }
 0x148   :  { %2225 = vmatpush.bf16.msra.mxu3 %v3073_v28  ;;  %2247 = vmatpush.bf16.msrb.mxu1 %v3633_v29  ;;  %v3130_v28 = vld [vmem:[%s5988_s5 + $0x28c] sm:$0xf0]  ;;  %v4004_v29 = vld [vmem:[%s5988_s5 + $0x6d4] sm:$0xf]  ;;  %v2996_v46 = vld [vmem:[%s5988_s5 + $0x160] sm:$0xf] }
 0x149   :  { %v3133_v38 = vor.u32 %v3864_v26, %v3130_v28  ;;  %v3693_v39 = vor.u32 %v4004_v29, %v3690_v31  ;;  %v3889_v26 = vld [vmem:[%s5988_s5 + $0x338] sm:$0xf0]  ;;  %v2822_v28 = vld [vmem:[%s5988_s5 + $0x24] sm:$0xf0]  ;;  %v3927_v29 = vld [vmem:[%s5988_s5 + $0x46c] sm:$0xf] }
 0x14a   :  { %2211 = vmatpush.bf16.msra.mxu2 %v2877_v35  ;;  %2233 = vmatpush.bf16.msrb.mxu0 %v3437_v36  ;;  %v3493_v35 = vor.u32 %v3958_v25, %v3492_v24  ;;  %v3815_v36 = vld [vmem:[%s5988_s5 + $0xec] sm:$0xf]  ;;  %v3220_v25 = vld [vmem:[%s5988_s5 + $0x320] sm:$0xf]  ;;  %v3382_v31 = vld [vmem:[%s5988_s5 + $0x484] sm:$0xf0] }
 0x14b   :  { %v3833_v47 = vld [vmem:[%s5988_s5 + $0x178] sm:$0xf0]  ;;  %v3522_v50 = vld [vmem:[%s5988_s5 + $0x59c] sm:$0xf0]  ;;  %v4008_v5 = vld [vmem:[%s5988_s5 + $0x6f0] sm:$0xf0] }
 0x14c   :  { %2226 = vmatpush.bf16.msra.mxu3 %v3045_v43  ;;  %2248 = vmatpush.bf16.msrb.mxu1 %v3605_v44  ;;  %v3997_v43 = vld [vmem:[%s5988_s5 + $0x69c] sm:$0xf]  ;;  %v3662_v44 = vld [vmem:[%s5988_s5 + $0x6b4] sm:$0xf0] }
 0x14d   :  { %v3665_v53 = vor.u32 %v3997_v43, %v3662_v44  ;;  %v3920_v43 = vld [vmem:[%s5988_s5 + $0x434] sm:$0xf]  ;;  %v3354_v44 = vld [vmem:[%s5988_s5 + $0x44c] sm:$0xf0] }
 0x14e   :  { %2212 = vmatpush.bf16.msra.mxu2 %v2849_v48  ;;  %2234 = vmatpush.bf16.msrb.mxu0 %v3409_v49  ;;  %v3808_v48 = vld [vmem:[%s5988_s5 + $0xb4] sm:$0xf]  ;;  %v2906_v49 = vld [vmem:[%s5988_s5 + $0xcc] sm:$0xf0]  ;;  %v3357_v51 = vor.u32 %v3920_v43, %v3354_v44  ;;  %v3847_v44 = vld [vmem:[%s5988_s5 + $0x1e8] sm:$0xf0] }
 0x14f   :  { %2201 = vmatmul.bf16.vlgmr.msra.gmra.mxu1 %v5038_v62  ;;  %2227 = vmatmul.bf16.vlgmr.msra.gmra.mxu3 %v4973_v15 }
 0x150   :  { %2271 = vmatpush.bf16.msrb.mxu3 %v3245_v45  ;;  %2249 = vmatpush.bf16.msrb.mxu1 %v3577_v56  ;;  %v2937_v45 = vor.u32 %v3815_v36, %v2934_v37  ;;  %v3074_v56 = vld [vmem:[%s5988_s5 + $0x21c] sm:$0xf0]  ;;  %v3969_v36 = vld [vmem:[%s5988_s5 + $0x5bc] sm:$0xf]  ;;  %v3550_v37 = vld [vmem:[%s5988_s5 + $0x5d4] sm:$0xf0] }
 0x151   :  { %v3077_v2 = vor.u32 %v3850_v54, %v3074_v56  ;;  %v2997_v54 = vor.u32 %v3833_v47, %v2996_v46  ;;  %v3326_v56 = vld [vmem:[%s5988_s5 + $0x414] sm:$0xf0]  ;;  %v3987_v46 = vld [vmem:[%s5988_s5 + $0x648] sm:$0xf0] }
 0x152   :  { %2213 = vmatpush.bf16.msra.mxu2 %v2821_v63  ;;  %2235 = vmatpush.bf16.msrb.mxu0 %v3381_v0  ;;  %v2878_v63 = vld [vmem:[%s5988_s5 + $0x94] sm:$0xf0]  ;;  %v3941_v0 = vld [vmem:[%s5988_s5 + $0x4dc] sm:$0xf] }
 0x153   :  { %v2881_v8 = vor.u32 %v3801_v61, %v2878_v63  ;;  %v3955_v61 = vld [vmem:[%s5988_s5 + $0x54c] sm:$0xf]  ;;  %v3494_v63 = vld [vmem:[%s5988_s5 + $0x564] sm:$0xf0] }
 0x154   :  { %2272 = vmatpush.bf16.msrb.mxu3 %v3217_v59  ;;  %2250 = vmatpush.bf16.msrb.mxu1 %v3549_v6  ;;  %v2909_v59 = vor.u32 %v3808_v48, %v2906_v49  ;;  %v3983_v6 = vld [vmem:[%s5988_s5 + $0x62c] sm:$0xf]  ;;  %v3962_v49 = vld [vmem:[%s5988_s5 + $0x584] sm:$0xf] }
 0x155   :  { %2188 = vmatmul.bf16.vlgmr.msra.gmra.mxu0 %v5078_v22  ;;  %2214 = vmatmul.bf16.vlgmr.msra.gmra.mxu2 %v4995_v30  ;;  %v3609_v18 = vor.u32 %v3983_v6, %v3606_v7  ;;  %v3906_v6 = vld [vmem:[%s5988_s5 + $0x3c4] sm:$0xf]  ;;  %v3298_v7 = vld [vmem:[%s5988_s5 + $0x3dc] sm:$0xf0] }
 0x156   :  { %2258 = vmatpush.bf16.msrb.mxu2 %v3021_v4  ;;  %2236 = vmatpush.bf16.msrb.mxu0 %v3353_v12  ;;  %v3637_v4 = vor.u32 %v3990_v57, %v3634_v58  ;;  %v3794_v12 = vld [vmem:[%s5988_s5 + $0x44] sm:$0xf]  ;;  %v3525_v57 = vor.u32 %v3962_v49, %v3522_v50  ;;  %v2968_v58 = vld [vmem:[%s5988_s5 + $0x128] sm:$0xf]  ;;  %v3893_v49 = vld [vmem:[%s5988_s5 + $0x35c] sm:$0xf] }
 0x157   :  { %v3250_v50 = vld [vmem:[%s5988_s5 + $0x374] sm:$0xf0] }
 0x158   :  { %2273 = vmatpush.bf16.msrb.mxu3 %v3189_v9  ;;  %2251 = vmatpush.bf16.msrb.mxu1 %v3521_v19  ;;  %v3441_v9 = vor.u32 %v3941_v0, %v3438_v1  ;;  %v3249_v19 = vor.u32 %v3896_v11, %v3248_v10  ;;  %v3136_v0 = vld [vmem:[%s5988_s5 + $0x278] sm:$0xf]  ;;  %v3819_v10 = vld [vmem:[%s5988_s5 + $0x108] sm:$0xf0] }
 0x15a   :  { %2259 = vmatpush.bf16.msrb.mxu2 %v2993_v16  ;;  %2237 = vmatpush.bf16.msrb.mxu0 %v3325_v27  ;;  %v3410_v16 = vld [vmem:[%s5988_s5 + $0x4bc] sm:$0xf0]  ;;  %v3787_v27 = vld [vmem:[%s5988_s5 + $0xc] sm:$0xf] }
 0x15b   :  { %v3413_v24 = vor.u32 %v3934_v14, %v3410_v16  ;;  %v3301_v14 = vor.u32 %v3906_v6, %v3298_v7  ;;  %v3861_v16 = vld [vmem:[%s5988_s5 + $0x258] sm:$0xf0]  ;;  %v3026_v6 = vld [vmem:[%s5988_s5 + $0x1b4] sm:$0xf0] }
 0x15c   :  { %2274 = vmatpush.bf16.msrb.mxu3 %v3161_v23  ;;  %2252 = vmatpush.bf16.msrb.mxu1 %v3493_v35  ;;  %v2853_v23 = vor.u32 %v3794_v12, %v2850_v13  ;;  %v3221_v35 = vor.u32 %v3889_v26, %v3220_v25  ;;  %v3108_v13 = vld [vmem:[%s5988_s5 + $0x240] sm:$0xf]  ;;  %v3472_v25 = vld [vmem:[%s5988_s5 + $0x518] sm:$0xf]  ;;  %v3952_v26 = vld [vmem:[%s5988_s5 + $0x530] sm:$0xf0] }
 0x15d   :  { %v3473_v34 = vor.u32 %v3952_v26, %v3472_v25  ;;  %v3528_v25 = vld [vmem:[%s5988_s5 + $0x588] sm:$0xf]  ;;  %v3966_v26 = vld [vmem:[%s5988_s5 + $0x5a0] sm:$0xf0] }
 0x15e   :  { %2260 = vmatpush.bf16.msrb.mxu2 %v2965_v32  ;;  %2238 = vmatpush.bf16.msrb.mxu0 %v3297_v41  ;;  %v3581_v32 = vor.u32 %v3976_v20, %v3578_v21  ;;  %v3882_v41 = vld [vmem:[%s5988_s5 + $0x300] sm:$0xf0]  ;;  %v3899_v20 = vld [vmem:[%s5988_s5 + $0x38c] sm:$0xf]  ;;  %v3270_v21 = vld [vmem:[%s5988_s5 + $0x3a4] sm:$0xf0] }
 0x15f   :  { %2253 = vmatmul.bf16.vlgmr.msrb.gmra.mxu1 %v5038_v62  ;;  %v3193_v48 = vor.u32 %v3882_v41, %v3192_v40  ;;  %v3945_v40 = vld [vmem:[%s5988_s5 + $0x4f8] sm:$0xf0] }
 0x160   :  { %2275 = vmatpush.bf16.msrb.mxu3 %v3133_v38  ;;  %2297 = vmatpush.bf16.msra.mxu1 %v3693_v39  ;;  %v2825_v38 = vor.u32 %v3787_v27, %v2822_v28  ;;  %v3385_v39 = vor.u32 %v3927_v29, %v3382_v31  ;;  %v3109_v27 = vor.u32 %v3861_v16, %v3108_v13  ;;  %v3080_v31 = vld [vmem:[%s5988_s5 + $0x208] sm:$0xf]  ;;  %v3879_v13 = vld [vmem:[%s5988_s5 + $0x2ec] sm:$0xf] }
 0x161   :  { %v3273_v29 = vor.u32 %v3899_v20, %v3270_v21  ;;  %v3194_v16 = vld [vmem:[%s5988_s5 + $0x304] sm:$0xf0]  ;;  %v2998_v20 = vld [vmem:[%s5988_s5 + $0x17c] sm:$0xf0] }
 0x162   :  { %2261 = vmatpush.bf16.msrb.mxu2 %v2937_v45  ;;  %2239 = vmatpush.bf16.msrb.mxu0 %v3269_v55  ;;  %v3553_v45 = vor.u32 %v3969_v36, %v3550_v37  ;;  %v3913_v55 = vld [vmem:[%s5988_s5 + $0x3fc] sm:$0xf]  ;;  %v3994_v36 = vld [vmem:[%s5988_s5 + $0x680] sm:$0xf0]  ;;  %v2884_v37 = vld [vmem:[%s5988_s5 + $0x80] sm:$0xf] }
 0x163   :  { %v3329_v1 = vor.u32 %v3913_v55, %v3326_v56 }
 0x164   :  { %2276 = vmatpush.bf16.msrb.mxu3 %v3105_v52  ;;  %2298 = vmatpush.bf16.msra.mxu1 %v3665_v53  ;;  %v3164_v52 = vld [vmem:[%s5988_s5 + $0x2b0] sm:$0xf]  ;;  %v3875_v53 = vld [vmem:[%s5988_s5 + $0x2c8] sm:$0xf0] }
 0x165   :  { %2240 = vmatmul.bf16.vlgmr.msrb.gmra.mxu0 %v5078_v22 }
 0x166   :  { %2262 = vmatpush.bf16.msrb.mxu2 %v2909_v59  ;;  %2284 = vmatpush.bf16.msra.mxu0 %v3469_v60  ;;  %v3826_v59 = vld [vmem:[%s5988_s5 + $0x140] sm:$0xf0]  ;;  %v3165_v60 = vor.u32 %v3875_v53, %v3164_v52  ;;  %v3416_v53 = vld [vmem:[%s5988_s5 + $0x4a8] sm:$0xf] }
 0x167   :  { %v2969_v3 = vor.u32 %v3826_v59, %v2968_v58  ;;  %v3798_v52 = vld [vmem:[%s5988_s5 + $0x60] sm:$0xf0]  ;;  %v3584_v58 = vld [vmem:[%s5988_s5 + $0x5f8] sm:$0xf]  ;;  %v3980_v59 = vld [vmem:[%s5988_s5 + $0x610] sm:$0xf0] }
 0x168   :  { %2277 = vmatpush.bf16.msrb.mxu3 %v3077_v2  ;;  %2299 = vmatpush.bf16.msra.mxu1 %v3637_v4  ;;  %v3868_v2 = vld [vmem:[%s5988_s5 + $0x290] sm:$0xf0]  ;;  %v3696_v4 = vld [vmem:[%s5988_s5 + $0x6d8] sm:$0xf]  ;;  %v3585_v7 = vor.u32 %v3980_v59, %v3584_v58  ;;  %v3276_v58 = vld [vmem:[%s5988_s5 + $0x390] sm:$0xf] }
 0x169   :  { %v3137_v11 = vor.u32 %v3868_v2, %v3136_v0  ;;  %v3697_v12 = vor.u32 %v4008_v5, %v3696_v4  ;;  %v3222_v0 = vld [vmem:[%s5988_s5 + $0x33c] sm:$0xf0]  ;;  %v3791_v2 = vld [vmem:[%s5988_s5 + $0x28] sm:$0xf0]  ;;  %v3388_v4 = vld [vmem:[%s5988_s5 + $0x470] sm:$0xf] }
 0x16a   :  { %2263 = vmatpush.bf16.msrb.mxu2 %v2881_v8  ;;  %2285 = vmatpush.bf16.msra.mxu0 %v3441_v9  ;;  %v3497_v8 = vor.u32 %v3955_v61, %v3494_v63  ;;  %v2940_v9 = vld [vmem:[%s5988_s5 + $0xf0] sm:$0xf]  ;;  %v3886_v63 = vld [vmem:[%s5988_s5 + $0x324] sm:$0xf]  ;;  %v3931_v5 = vld [vmem:[%s5988_s5 + $0x488] sm:$0xf0] }
 0x16b   :  { %v3903_v59 = vld [vmem:[%s5988_s5 + $0x3a8] sm:$0xf0] }
 0x16c   :  { %2278 = vmatpush.bf16.msrb.mxu3 %v3049_v17  ;;  %2300 = vmatpush.bf16.msra.mxu1 %v3609_v18  ;;  %v3668_v17 = vld [vmem:[%s5988_s5 + $0x6a0] sm:$0xf]  ;;  %v4001_v18 = vld [vmem:[%s5988_s5 + $0x6b8] sm:$0xf0] }
 0x16d   :  { %v3669_v28 = vor.u32 %v4001_v18, %v3668_v17  ;;  %v3360_v17 = vld [vmem:[%s5988_s5 + $0x438] sm:$0xf]  ;;  %v3924_v18 = vld [vmem:[%s5988_s5 + $0x450] sm:$0xf0] }
 0x16e   :  { %2264 = vmatpush.bf16.msrb.mxu2 %v2853_v23  ;;  %2286 = vmatpush.bf16.msra.mxu0 %v3413_v24  ;;  %v2912_v23 = vld [vmem:[%s5988_s5 + $0xb8] sm:$0xf]  ;;  %v3812_v24 = vld [vmem:[%s5988_s5 + $0xd0] sm:$0xf0] }
 0x16f   :  { %2279 = vmatmul.bf16.vlgmr.msrb.gmra.mxu3 %v4973_v15  ;;  %v2913_v33 = vor.u32 %v3812_v24, %v2912_v23  ;;  %v3197_v23 = vor.u32 %v3879_v13, %v3194_v16  ;;  %v3361_v24 = vor.u32 %v3924_v18, %v3360_v17  ;;  %v3446_v13 = vld [vmem:[%s5988_s5 + $0x4fc] sm:$0xf0]  ;;  %v3844_v16 = vld [vmem:[%s5988_s5 + $0x1d4] sm:$0xf] }
 0x170   :  { %2323 = vmatpush.bf16.msra.mxu3 %v3249_v19  ;;  %2301 = vmatpush.bf16.msra.mxu1 %v3581_v32  ;;  %v2941_v19 = vor.u32 %v3819_v10, %v2940_v9  ;;  %v3854_v32 = vld [vmem:[%s5988_s5 + $0x220] sm:$0xf0]  ;;  %v3389_v10 = vor.u32 %v3931_v5, %v3388_v4  ;;  %v3277_v4 = vor.u32 %v3903_v59, %v3276_v58 }
 0x171   :  { %v3081_v41 = vor.u32 %v3854_v32, %v3080_v31  ;;  %v3332_v31 = vld [vmem:[%s5988_s5 + $0x400] sm:$0xf]  ;;  %v3917_v32 = vld [vmem:[%s5988_s5 + $0x418] sm:$0xf0]  ;;  %v3834_v58 = vld [vmem:[%s5988_s5 + $0x180] sm:$0xf0] }
 0x172   :  { %2265 = vmatpush.bf16.msrb.mxu2 %v2825_v38  ;;  %2287 = vmatpush.bf16.msra.mxu0 %v3385_v39  ;;  %v3805_v38 = vld [vmem:[%s5988_s5 + $0x98] sm:$0xf0]  ;;  %v3444_v39 = vld [vmem:[%s5988_s5 + $0x4e0] sm:$0xf] }
 0x173   :  { %v2885_v47 = vor.u32 %v3805_v38, %v2884_v37  ;;  %v3333_v38 = vor.u32 %v3917_v32, %v3332_v31 }
 0x174   :  { %2324 = vmatpush.bf16.msra.mxu3 %v3221_v35  ;;  %2302 = vmatpush.bf16.msra.mxu1 %v3553_v45  ;;  %v3640_v35 = vld [vmem:[%s5988_s5 + $0x668] sm:$0xf]  ;;  %v3612_v45 = vld [vmem:[%s5988_s5 + $0x630] sm:$0xf] }
 0x175   :  { %2266 = vmatmul.bf16.vlgmr.msrb.gmra.mxu2 %v4995_v30  ;;  %v3641_v43 = vor.u32 %v3994_v36, %v3640_v35  ;;  %v3613_v56 = vor.u32 %v3987_v46, %v3612_v45  ;;  %v3529_v35 = vor.u32 %v3966_v26, %v3528_v25  ;;  %v3500_v36 = vld [vmem:[%s5988_s5 + $0x550] sm:$0xf]  ;;  %v3304_v45 = vld [vmem:[%s5988_s5 + $0x3c8] sm:$0xf]  ;;  %v3910_v46 = vld [vmem:[%s5988_s5 + $0x3e0] sm:$0xf0] }
 0x176   :  { %2310 = vmatpush.bf16.msra.mxu2 %v3025_v42  ;;  %2288 = vmatpush.bf16.msra.mxu0 %v3357_v51  ;;  %v3052_v42 = vld [vmem:[%s5988_s5 + $0x1d0] sm:$0xf]  ;;  %v2856_v51 = vld [vmem:[%s5988_s5 + $0x48] sm:$0xf]  ;;  %v3897_v25 = vld [vmem:[%s5988_s5 + $0x378] sm:$0xf0] }
 0x177   :  { %v3053_v55 = vor.u32 %v3847_v44, %v3052_v42  ;;  %v3698_v44 = vld [vmem:[%s5988_s5 + $0x6f4] sm:$0xf0]  ;;  %v3795_v26 = vld [vmem:[%s5988_s5 + $0x4c] sm:$0xf] }
 0x178   :  { %2325 = vmatpush.bf16.msra.mxu3 %v3193_v48  ;;  %2303 = vmatpush.bf16.msra.mxu1 %v3525_v57  ;;  %v3445_v48 = vor.u32 %v3945_v40, %v3444_v39  ;;  %v3253_v57 = vor.u32 %v3893_v49, %v3250_v50  ;;  %v3959_v39 = vld [vmem:[%s5988_s5 + $0x568] sm:$0xf0]  ;;  %v3865_v40 = vld [vmem:[%s5988_s5 + $0x27c] sm:$0xf] }
 0x179   :  { %v3501_v49 = vor.u32 %v3959_v39, %v3500_v36  ;;  %v3890_v39 = vld [vmem:[%s5988_s5 + $0x340] sm:$0xf0] }
 0x17a   :  { %2311 = vmatpush.bf16.msra.mxu2 %v2997_v54  ;;  %2289 = vmatpush.bf16.msra.mxu0 %v3329_v1  ;;  %v3938_v54 = vld [vmem:[%s5988_s5 + $0x4c0] sm:$0xf0]  ;;  %v2828_v1 = vld [vmem:[%s5988_s5 + $0x10] sm:$0xf] }
 0x17b   :  { %v3417_v61 = vor.u32 %v3938_v54, %v3416_v53  ;;  %v2829_v9 = vor.u32 %v3791_v2, %v2828_v1  ;;  %v3110_v53 = vld [vmem:[%s5988_s5 + $0x25c] sm:$0xf0]  ;;  %v3305_v54 = vor.u32 %v3910_v46, %v3304_v45  ;;  %v3841_v45 = vld [vmem:[%s5988_s5 + $0x1b8] sm:$0xf0] }
 0x17c   :  { %2326 = vmatpush.bf16.msra.mxu3 %v3165_v60  ;;  %2304 = vmatpush.bf16.msra.mxu1 %v3497_v8  ;;  %v2857_v60 = vor.u32 %v3798_v52, %v2856_v51  ;;  %v3225_v8 = vor.u32 %v3886_v63, %v3222_v0  ;;  %v3858_v52 = vld [vmem:[%s5988_s5 + $0x244] sm:$0xf]  ;;  %v3949_v63 = vld [vmem:[%s5988_s5 + $0x51c] sm:$0xf]  ;;  %v3474_v0 = vld [vmem:[%s5988_s5 + $0x534] sm:$0xf0] }
 0x17d   :  { %v3113_v1 = vor.u32 %v3858_v52, %v3110_v53  ;;  %v3200_v52 = vld [vmem:[%s5988_s5 + $0x2f0] sm:$0xf] }
 0x17e   :  { %2312 = vmatpush.bf16.msra.mxu2 %v2969_v3  ;;  %2290 = vmatpush.bf16.msra.mxu0 %v3301_v14  ;;  %v3837_v3 = vld [vmem:[%s5988_s5 + $0x19c] sm:$0xf] }
 0x17f   :  { %2305 = vmatmul.bf16.vlgmr.msra.gmra.mxu1 %v5038_v62  ;;  %v3029_v14 = vor.u32 %v3837_v3, %v3026_v6  ;;  %v3851_v3 = vld [vmem:[%s5988_s5 + $0x20c] sm:$0xf]  ;;  %v3082_v6 = vld [vmem:[%s5988_s5 + $0x224] sm:$0xf0] }
 0x180   :  { %2327 = vmatpush.bf16.msra.mxu3 %v3137_v11  ;;  %2349 = vmatpush.bf16.msrb.mxu1 %v3697_v12  ;;  %v3556_v11 = vld [vmem:[%s5988_s5 + $0x5c0] sm:$0xf]  ;;  %v3973_v12 = vld [vmem:[%s5988_s5 + $0x5d8] sm:$0xf0] }
 0x181   :  { %v3557_v21 = vor.u32 %v3973_v12, %v3556_v11  ;;  %v2886_v11 = vld [vmem:[%s5988_s5 + $0x9c] sm:$0xf0]  ;;  %v3942_v12 = vld [vmem:[%s5988_s5 + $0x4e4] sm:$0xf] }
 0x182   :  { %2313 = vmatpush.bf16.msra.mxu2 %v2941_v19  ;;  %2291 = vmatpush.bf16.msra.mxu0 %v3273_v29  ;;  %v3830_v19 = vld [vmem:[%s5988_s5 + $0x164] sm:$0xf]  ;;  %v3166_v29 = vld [vmem:[%s5988_s5 + $0x2cc] sm:$0xf0] }
 0x184   :  { %2328 = vmatpush.bf16.msra.mxu3 %v3109_v27  ;;  %2350 = vmatpush.bf16.msrb.mxu1 %v3669_v28  ;;  %v3872_v27 = vld [vmem:[%s5988_s5 + $0x2b4] sm:$0xf]  ;;  %v3001_v28 = vor.u32 %v3830_v19, %v2998_v20  ;;  %v3054_v19 = vld [vmem:[%s5988_s5 + $0x1ec] sm:$0xf0] }
 0x185   :  { %2292 = vmatmul.bf16.vlgmr.msra.gmra.mxu0 %v5078_v22  ;;  %v3169_v37 = vor.u32 %v3872_v27, %v3166_v29  ;;  %v3984_v20 = vld [vmem:[%s5988_s5 + $0x634] sm:$0xf]  ;;  %v2858_v27 = vld [vmem:[%s5988_s5 + $0x64] sm:$0xf0]  ;;  %v3057_v31 = vor.u32 %v3844_v16, %v3054_v19  ;;  %v3907_v19 = vld [vmem:[%s5988_s5 + $0x3cc] sm:$0xf] }
 0x186   :  { %2314 = vmatpush.bf16.msra.mxu2 %v2913_v33  ;;  %2336 = vmatpush.bf16.msrb.mxu0 %v3473_v34  ;;  %v3823_v33 = vld [vmem:[%s5988_s5 + $0x12c] sm:$0xf]  ;;  %v2970_v34 = vld [vmem:[%s5988_s5 + $0x144] sm:$0xf0]  ;;  %v2861_v36 = vor.u32 %v3795_v26, %v2858_v27 }
 0x187   :  { %v2973_v42 = vor.u32 %v3823_v33, %v2970_v34  ;;  %v3418_v29 = vld [vmem:[%s5988_s5 + $0x4c4] sm:$0xf0]  ;;  %v3977_v34 = vld [vmem:[%s5988_s5 + $0x5fc] sm:$0xf] }
 0x188   :  { %2329 = vmatpush.bf16.msra.mxu3 %v3081_v41  ;;  %2351 = vmatpush.bf16.msrb.mxu1 %v3641_v43  ;;  %v3138_v41 = vld [vmem:[%s5988_s5 + $0x294] sm:$0xf0]  ;;  %v4005_v43 = vld [vmem:[%s5988_s5 + $0x6dc] sm:$0xf] }
 0x189   :  { %v3141_v50 = vor.u32 %v3865_v40, %v3138_v41  ;;  %v3701_v51 = vor.u32 %v4005_v43, %v3698_v44  ;;  %v3788_v40 = vld [vmem:[%s5988_s5 + $0x14] sm:$0xf]  ;;  %v2830_v41 = vld [vmem:[%s5988_s5 + $0x2c] sm:$0xf0]  ;;  %v3032_v44 = vld [vmem:[%s5988_s5 + $0x1a0] sm:$0xf] }
 0x18a   :  { %2315 = vmatpush.bf16.msra.mxu2 %v2885_v47  ;;  %2337 = vmatpush.bf16.msrb.mxu0 %v3445_v48  ;;  %v3816_v47 = vld [vmem:[%s5988_s5 + $0xf4] sm:$0xf]  ;;  %v2942_v48 = vld [vmem:[%s5988_s5 + $0x10c] sm:$0xf0]  ;;  %v3033_v53 = vor.u32 %v3841_v45, %v3032_v44 }
 0x18b   :  { %v3390_v43 = vld [vmem:[%s5988_s5 + $0x48c] sm:$0xf0] }
 0x18c   :  { %2330 = vmatpush.bf16.msra.mxu3 %v3053_v55  ;;  %2352 = vmatpush.bf16.msrb.mxu1 %v3613_v56  ;;  %v2945_v55 = vor.u32 %v3816_v47, %v2942_v48  ;;  %v3998_v56 = vld [vmem:[%s5988_s5 + $0x6a4] sm:$0xf]  ;;  %v2833_v48 = vor.u32 %v3788_v40, %v2830_v41  ;;  %v3953_v40 = vld [vmem:[%s5988_s5 + $0x538] sm:$0xf0] }
 0x18e   :  { %2316 = vmatpush.bf16.msra.mxu2 %v2857_v60  ;;  %2338 = vmatpush.bf16.msrb.mxu0 %v3417_v61  ;;  %v3809_v60 = vld [vmem:[%s5988_s5 + $0xbc] sm:$0xf]  ;;  %v2914_v61 = vld [vmem:[%s5988_s5 + $0xd4] sm:$0xf0] }
 0x18f   :  { %2331 = vmatmul.bf16.vlgmr.msra.gmra.mxu3 %v4973_v15  ;;  %v2917_v5 = vor.u32 %v3809_v60, %v2914_v61 }
 0x190   :  { %2375 = vmatpush.bf16.msrb.mxu3 %v3253_v57  ;;  %2353 = vmatpush.bf16.msrb.mxu1 %v3585_v7  ;;  %v3670_v57 = vld [vmem:[%s5988_s5 + $0x6bc] sm:$0xf0]  ;;  %v3991_v7 = vld [vmem:[%s5988_s5 + $0x66c] sm:$0xf] }
 0x191   :  { %v3673_v2 = vor.u32 %v3998_v56, %v3670_v57  ;;  %v3362_v56 = vld [vmem:[%s5988_s5 + $0x454] sm:$0xf0]  ;;  %v3004_v57 = vld [vmem:[%s5988_s5 + $0x168] sm:$0xf] }
 0x192   :  { %2317 = vmatpush.bf16.msra.mxu2 %v2829_v9  ;;  %2339 = vmatpush.bf16.msrb.mxu0 %v3389_v10  ;;  %v3642_v9 = vld [vmem:[%s5988_s5 + $0x684] sm:$0xf0]  ;;  %v3802_v10 = vld [vmem:[%s5988_s5 + $0x84] sm:$0xf] }
 0x193   :  { %v3645_v17 = vor.u32 %v3991_v7, %v3642_v9  ;;  %v2889_v18 = vor.u32 %v3802_v10, %v2886_v11  ;;  %v3827_v7 = vld [vmem:[%s5988_s5 + $0x148] sm:$0xf0]  ;;  %v3956_v9 = vld [vmem:[%s5988_s5 + $0x554] sm:$0xf] }
 0x194   :  { %2376 = vmatpush.bf16.msrb.mxu3 %v3225_v8  ;;  %2354 = vmatpush.bf16.msrb.mxu1 %v3557_v21  ;;  %v3477_v8 = vor.u32 %v3949_v63, %v3474_v0  ;;  %v3614_v21 = vld [vmem:[%s5988_s5 + $0x64c] sm:$0xf0]  ;;  %v3963_v63 = vld [vmem:[%s5988_s5 + $0x58c] sm:$0xf]  ;;  %v3530_v0 = vld [vmem:[%s5988_s5 + $0x5a4] sm:$0xf0] }
 0x195   :  { %2318 = vmatmul.bf16.vlgmr.msra.gmra.mxu2 %v4995_v30  ;;  %v3617_v32 = vor.u32 %v3984_v20, %v3614_v21  ;;  %v3306_v20 = vld [vmem:[%s5988_s5 + $0x3e4] sm:$0xf0]  ;;  %v2948_v21 = vld [vmem:[%s5988_s5 + $0xf8] sm:$0xf] }
 0x196   :  { %2362 = vmatpush.bf16.msrb.mxu2 %v3029_v14  ;;  %2340 = vmatpush.bf16.msrb.mxu0 %v3361_v24  ;;  %v3085_v14 = vor.u32 %v3851_v3, %v3082_v6  ;;  %v3256_v24 = vld [vmem:[%s5988_s5 + $0x360] sm:$0xf]  ;;  %v2976_v6 = vld [vmem:[%s5988_s5 + $0x130] sm:$0xf] }
 0x197   :  { %v3257_v33 = vor.u32 %v3897_v25, %v3256_v24  ;;  %v3334_v3 = vld [vmem:[%s5988_s5 + $0x41c] sm:$0xf0]  ;;  %v2977_v16 = vor.u32 %v3827_v7, %v2976_v6  ;;  %v3424_v7 = vld [vmem:[%s5988_s5 + $0x4b0] sm:$0xf] }
 0x198   :  { %2377 = vmatpush.bf16.msrb.mxu3 %v3197_v23  ;;  %2355 = vmatpush.bf16.msrb.mxu1 %v3529_v35  ;;  %v3449_v23 = vor.u32 %v3942_v12, %v3446_v13  ;;  %v3586_v35 = vld [vmem:[%s5988_s5 + $0x614] sm:$0xf0]  ;;  %v3502_v12 = vld [vmem:[%s5988_s5 + $0x56c] sm:$0xf0]  ;;  %v3144_v13 = vld [vmem:[%s5988_s5 + $0x280] sm:$0xf] }
 0x199   :  { %v3589_v46 = vor.u32 %v3977_v34, %v3586_v35  ;;  %v3505_v24 = vor.u32 %v3956_v9, %v3502_v12  ;;  %v4002_v34 = vld [vmem:[%s5988_s5 + $0x6c0] sm:$0xf0]  ;;  %v3900_v35 = vld [vmem:[%s5988_s5 + $0x394] sm:$0xf]  ;;  %v3592_v12 = vld [vmem:[%s5988_s5 + $0x600] sm:$0xf] }
 0x19a   :  { %2363 = vmatpush.bf16.msrb.mxu2 %v3001_v28  ;;  %2341 = vmatpush.bf16.msrb.mxu0 %v3333_v38  ;;  %v3935_v28 = vld [vmem:[%s5988_s5 + $0x4ac] sm:$0xf]  ;;  %v3228_v38 = vld [vmem:[%s5988_s5 + $0x328] sm:$0xf] }
 0x19b   :  { %v3229_v47 = vor.u32 %v3890_v39, %v3228_v38  ;;  %v3813_v38 = vld [vmem:[%s5988_s5 + $0xd8] sm:$0xf0]  ;;  %v3480_v39 = vld [vmem:[%s5988_s5 + $0x520] sm:$0xf] }
 0x19c   :  { %2378 = vmatpush.bf16.msrb.mxu3 %v3169_v37  ;;  %2356 = vmatpush.bf16.msrb.mxu1 %v3501_v49  ;;  %v3421_v37 = vor.u32 %v3935_v28, %v3418_v29  ;;  %v3116_v28 = vld [vmem:[%s5988_s5 + $0x248] sm:$0xf]  ;;  %v3862_v29 = vld [vmem:[%s5988_s5 + $0x260] sm:$0xf0] }
 0x19d   :  { %v3117_v41 = vor.u32 %v3862_v29, %v3116_v28 }
 0x19e   :  { %2364 = vmatpush.bf16.msrb.mxu2 %v2973_v42  ;;  %2342 = vmatpush.bf16.msrb.mxu0 %v3305_v54  ;;  %v3928_v42 = vld [vmem:[%s5988_s5 + $0x474] sm:$0xf]  ;;  %v3883_v54 = vld [vmem:[%s5988_s5 + $0x308] sm:$0xf0] }
 0x19f   :  { %2357 = vmatmul.bf16.vlgmr.msrb.gmra.mxu1 %v5038_v62  ;;  %v3393_v49 = vor.u32 %v3928_v42, %v3390_v43  ;;  %v3201_v60 = vor.u32 %v3883_v54, %v3200_v52  ;;  %v5856_v43 = vld [vmem:[%s5989_s6] sm:$0x7f]  ;;  %v2892_v52 = vld [vmem:[%s5988_s5 + $0x88] sm:$0xf] }
 0x1a0   :  { %2379 = vmatpush.bf16.msrb.mxu3 %v3141_v50  ;;  %2401 = vmatpush.bf16.msra.mxu1 %v3701_v51  ;;  %v3970_v50 = vld [vmem:[%s5988_s5 + $0x5c4] sm:$0xf]  ;;  %v3558_v51 = vld [vmem:[%s5988_s5 + $0x5dc] sm:$0xf0]  ;;  %v936_v54 = vperm.slane %v5856_v43, 0 }
 0x1a1   :  { %v3561_v59 = vor.u32 %v3970_v50, %v3558_v51  ;;  %v3481_v50 = vor.u32 %v3953_v40, %v3480_v39  ;;  %v3995_v51 = vld [vmem:[%s5988_s5 + $0x688] sm:$0xf0]  ;;  %v3536_v39 = vld [vmem:[%s5988_s5 + $0x590] sm:$0xf]  ;;  %v937_v40 = vperm.slane %v5856_v43, 1 }
 0x1a2   :  { %2365 = vmatpush.bf16.msrb.mxu2 %v2945_v55  ;;  %2343 = vmatpush.bf16.msrb.mxu0 %v3277_v4  ;;  %v3921_v55 = vld [vmem:[%s5988_s5 + $0x43c] sm:$0xf]  ;;  %v3876_v4 = vld [vmem:[%s5988_s5 + $0x2d0] sm:$0xf0] }
 0x1a3   :  { %v3365_v61 = vor.u32 %v3921_v55, %v3362_v56  ;;  %v3452_v55 = vld [vmem:[%s5988_s5 + $0x4e8] sm:$0xf]  ;;  %v3946_v56 = vld [vmem:[%s5988_s5 + $0x500] sm:$0xf0] }
 0x1a4   :  { %2380 = vmatpush.bf16.msrb.mxu3 %v3113_v1  ;;  %2402 = vmatpush.bf16.msra.mxu1 %v3673_v2  ;;  %v3172_v1 = vld [vmem:[%s5988_s5 + $0x2b8] sm:$0xf]  ;;  %v3005_v2 = vor.u32 %v3834_v58, %v3004_v57 }
 0x1a5   :  { %2344 = vmatmul.bf16.vlgmr.msrb.gmra.mxu0 %v5078_v22  ;;  %v3173_v10 = vor.u32 %v3876_v4, %v3172_v1  ;;  %v3988_v4 = vld [vmem:[%s5988_s5 + $0x650] sm:$0xf0] }
 0x1a6   :  { %2366 = vmatpush.bf16.msrb.mxu2 %v2917_v5  ;;  %2388 = vmatpush.bf16.msra.mxu0 %v3477_v8  ;;  %v3914_v5 = vld [vmem:[%s5988_s5 + $0x404] sm:$0xf]  ;;  %v3533_v8 = vor.u32 %v3963_v63, %v3530_v0  ;;  %v3848_v63 = vld [vmem:[%s5988_s5 + $0x1f0] sm:$0xf0]  ;;  %v3620_v0 = vld [vmem:[%s5988_s5 + $0x638] sm:$0xf] }
 0x1a7   :  { %v3337_v11 = vor.u32 %v3914_v5, %v3334_v3  ;;  %v2864_v5 = vld [vmem:[%s5988_s5 + $0x50] sm:$0xf]  ;;  %v3799_v3 = vld [vmem:[%s5988_s5 + $0x68] sm:$0xf0] }
 0x1a8   :  { %2381 = vmatpush.bf16.msrb.mxu3 %v3085_v14  ;;  %2403 = vmatpush.bf16.msra.mxu1 %v3645_v17  ;;  %v3869_v14 = vld [vmem:[%s5988_s5 + $0x298] sm:$0xf0]  ;;  %v3704_v17 = vld [vmem:[%s5988_s5 + $0x6e0] sm:$0xf] }
 0x1a9   :  { %v3145_v26 = vor.u32 %v3869_v14, %v3144_v13 }
 0x1aa   :  { %2367 = vmatpush.bf16.msrb.mxu2 %v2889_v18  ;;  %2389 = vmatpush.bf16.msra.mxu0 %v3449_v23  ;;  %v4009_v18 = vld [vmem:[%s5988_s5 + $0x6f8] sm:$0xf0]  ;;  %v3820_v23 = vld [vmem:[%s5988_s5 + $0x110] sm:$0xf0] }
 0x1ab   :  { %v3705_v27 = vor.u32 %v4009_v18, %v3704_v17  ;;  %v2836_v17 = vld [vmem:[%s5988_s5 + $0x18] sm:$0xf]  ;;  %v3792_v18 = vld [vmem:[%s5988_s5 + $0x30] sm:$0xf0] }
 0x1ac   :  { %2382 = vmatpush.bf16.msrb.mxu3 %v3057_v31  ;;  %2404 = vmatpush.bf16.msra.mxu1 %v3617_v32  ;;  %v3309_v31 = vor.u32 %v3907_v19, %v3306_v20  ;;  %v2949_v32 = vor.u32 %v3820_v23, %v2948_v21  ;;  %v3396_v20 = vld [vmem:[%s5988_s5 + $0x478] sm:$0xf]  ;;  %v3932_v21 = vld [vmem:[%s5988_s5 + $0x490] sm:$0xf0]  ;;  %v2837_v28 = vor.u32 %v3792_v18, %v2836_v17  ;;  %v939_v17 = vperm.slane %v5856_v43, 3 }
 0x1ae   :  { %2368 = vmatpush.bf16.msrb.mxu2 %v2861_v36  ;;  %2390 = vmatpush.bf16.msra.mxu0 %v3421_v37  ;;  %v3278_v36 = vld [vmem:[%s5988_s5 + $0x3ac] sm:$0xf0]  ;;  %v2920_v37 = vld [vmem:[%s5988_s5 + $0xc0] sm:$0xf] }
 0x1af   :  { %2383 = vmatmul.bf16.vlgmr.msrb.gmra.mxu3 %v4973_v15  ;;  %v3281_v44 = vor.u32 %v3900_v35, %v3278_v36  ;;  %v2921_v45 = vor.u32 %v3813_v38, %v2920_v37  ;;  %v3925_v35 = vld [vmem:[%s5988_s5 + $0x458] sm:$0xf0] }
 0x1b0   :  { %2427 = vmatpush.bf16.msra.mxu3 %v3257_v33  ;;  %2405 = vmatpush.bf16.msra.mxu1 %v3589_v46  ;;  %v3676_v33 = vld [vmem:[%s5988_s5 + $0x6a8] sm:$0xf]  ;;  %v3088_v46 = vld [vmem:[%s5988_s5 + $0x210] sm:$0xf] }
 0x1b1   :  { %v3677_v42 = vor.u32 %v4002_v34, %v3676_v33  ;;  %v3368_v34 = vld [vmem:[%s5988_s5 + $0x440] sm:$0xf] }
 0x1b2   :  { %2369 = vmatpush.bf16.msrb.mxu2 %v2833_v48  ;;  %2391 = vmatpush.bf16.msra.mxu0 %v3393_v49  ;;  %v5821_v25 = vpop.f32.mrf.mxu3  ;;  %v3648_v48 = vld [vmem:[%s5988_s5 + $0x670] sm:$0xf]  ;;  %v3369_v38 = vor.u32 %v3925_v35, %v3368_v34 }
 0x1b4   :  { %2428 = vmatpush.bf16.msra.mxu3 %v3229_v47  ;;  %2406 = vmatpush.bf16.msra.mxu1 %v3561_v59  ;;  %v3855_v47 = vld [vmem:[%s5988_s5 + $0x228] sm:$0xf0]  ;;  %v3649_v59 = vor.u32 %v3995_v51, %v3648_v48 }
 0x1b5   :  { %2370 = vmatmul.bf16.vlgmr.msrb.gmra.mxu2 %v4995_v30  ;;  %v3089_v58 = vor.u32 %v3855_v47, %v3088_v46 }
 0x1b6   :  { %2414 = vmatpush.bf16.msra.mxu2 %v3033_v53  ;;  %2392 = vmatpush.bf16.msra.mxu0 %v3365_v61  ;;  %v3806_v53 = vld [vmem:[%s5988_s5 + $0xa0] sm:$0xf0]  ;;  %v3060_v61 = vld [vmem:[%s5988_s5 + $0x1d8] sm:$0xf] }
 0x1b7   :  { %v3061_v9 = vor.u32 %v3848_v63, %v3060_v61 }
 0x1b8   :  { %2429 = vmatpush.bf16.msra.mxu3 %v3201_v60  ;;  %2407 = vmatpush.bf16.msra.mxu1 %v3533_v8  ;;  %v2111_v49 = vpop.f32.mrf.mxu2  ;;  %v2893_v60 = vor.u32 %v3806_v53, %v2892_v52  ;;  %v3939_v8 = vld [vmem:[%s5988_s5 + $0x4c8] sm:$0xf0] }
 0x1b9   :  { %v2112_v6 = vadd.f32 %v2111_v49, %v936_v54  ;;  %v3425_v14 = vor.u32 %v3939_v8, %v3424_v7  ;;  %v3508_v49 = vld [vmem:[%s5988_s5 + $0x558] sm:$0xf]  ;;  %v3911_v52 = vld [vmem:[%s5988_s5 + $0x3e8] sm:$0xf0] }
 0x1ba   :  { %2415 = vmatpush.bf16.msra.mxu2 %v3005_v2  ;;  %2393 = vmatpush.bf16.msra.mxu0 %v3337_v11  ;;  %v2126_v57 = vpop.f32.mrf.mxu3  ;;  %v3453_v2 = vor.u32 %v3946_v56, %v3452_v55  ;;  %v2865_v11 = vor.u32 %v3799_v3, %v2864_v5 }
 0x1bb   :  { %v2125_v19 = vadd.f32 %v5821_v25, %v2112_v6  ;;  %v3564_v25 = vld [vmem:[%s5988_s5 + $0x5c8] sm:$0xf]  ;;  %v3284_v57 = vld [vmem:[%s5988_s5 + $0x398] sm:$0xf] }
 0x1bc   :  { %2430 = vmatpush.bf16.msra.mxu3 %v3173_v10  ;;  %2408 = vmatpush.bf16.msra.mxu1 %v3505_v24  ;;  %v2150_v1 = vpop.f32.mrf.mxu1  ;;  %v3621_v10 = vor.u32 %v3988_v4, %v3620_v0  ;;  %v938_v4 = vperm.slane %v5856_v43, 2 }
 0x1be   :  { %2416 = vmatpush.bf16.msra.mxu2 %v2977_v16  ;;  %2394 = vmatpush.bf16.msra.mxu0 %v3309_v31  ;;  %v3981_v16 = vld [vmem:[%s5988_s5 + $0x618] sm:$0xf0]  ;;  %v3397_v31 = vor.u32 %v3932_v21, %v3396_v20 }
 0x1bf   :  { %2409 = vmatmul.bf16.vlgmr.msra.gmra.mxu1 %v5038_v62 }
 0x1c0   :  { %2431 = vmatpush.bf16.msra.mxu3 %v3145_v26  ;;  %2453 = vmatpush.bf16.msrb.mxu1 %v3705_v27  ;;  %v2113_v13 = vpop.f32.mrf.mxu2  ;;  %v3593_v27 = vor.u32 %v3981_v16, %v3592_v12 }
 0x1c2   :  { %2417 = vmatpush.bf16.msra.mxu2 %v2949_v32  ;;  %2395 = vmatpush.bf16.msra.mxu0 %v3281_v44  ;;  %v2137_v23 = vpop.f32.mrf.mxu0  ;;  %v2176_v24 = vpop.f32.mrf.mxu3  ;;  %v3974_v32 = vld [vmem:[%s5988_s5 + $0x5e0] sm:$0xf0] }
 0x1c3   :  { %v2138_v26 = vadd.f32 %v2137_v23, %v2125_v19  ;;  %v3565_v36 = vor.u32 %v3974_v32, %v3564_v25  ;;  %v940_v25 = vperm.slane %v5856_v43, 4 }
 0x1c4   :  { %2432 = vmatpush.bf16.msra.mxu3 %v3117_v41  ;;  %2454 = vmatpush.bf16.msrb.mxu1 %v3677_v42  ;;  %v2152_v29 = vpop.f32.mrf.mxu1  ;;  %v3340_v41 = vld [vmem:[%s5988_s5 + $0x408] sm:$0xf]  ;;  %v3918_v42 = vld [vmem:[%s5988_s5 + $0x420] sm:$0xf0] }
 0x1c5   :  { %2396 = vmatmul.bf16.vlgmr.msra.gmra.mxu0 %v5078_v22  ;;  %v2151_v33 = vadd.f32 %v2150_v1, %v2138_v26  ;;  %v3341_v48 = vor.u32 %v3918_v42, %v3340_v41 }
 0x1c6   :  { %2418 = vmatpush.bf16.msra.mxu2 %v2921_v45  ;;  %2440 = vmatpush.bf16.msrb.mxu0 %v3481_v50  ;;  %v3960_v50 = vld [vmem:[%s5988_s5 + $0x570] sm:$0xf0] }
 0x1c7   :  { %2466 = vst [vmem:[#allocation2] sm:$0xff] %v2151_v33  ;;  %v3509_v53 = vor.u32 %v3960_v50, %v3508_v49 }
 0x1c8   :  { %2433 = vmatpush.bf16.msra.mxu3 %v3089_v58  ;;  %2455 = vmatpush.bf16.msrb.mxu1 %v3649_v59  ;;  %v2163_v37 = vpop.f32.mrf.mxu2  ;;  %v3904_v58 = vld [vmem:[%s5988_s5 + $0x3b0] sm:$0xf0] }
 0x1c9   :  { %v2164_v51 = vadd.f32 %v2163_v37, %v937_v40  ;;  %v3285_v0 = vor.u32 %v3904_v58, %v3284_v57 }
 0x1ca   :  { %2419 = vmatpush.bf16.msra.mxu2 %v2893_v60  ;;  %2441 = vmatpush.bf16.msrb.mxu0 %v3453_v2  ;;  %v2139_v44 = vpop.f32.mrf.mxu0  ;;  %v2178_v45 = vpop.f32.mrf.mxu3 }
 0x1cb   :  { %v2177_v56 = vadd.f32 %v2176_v24, %v2164_v51  ;;  %v941_v44 = vperm.slane %v5856_v43, 5 }
 0x1cc   :  { %2434 = vmatpush.bf16.msra.mxu3 %v3061_v9  ;;  %2456 = vmatpush.bf16.msrb.mxu1 %v3621_v10  ;;  %v2202_v47 = vpop.f32.mrf.mxu1 }
 0x1ce   :  { %2420 = vmatpush.bf16.msra.mxu2 %v2865_v11  ;;  %2442 = vmatpush.bf16.msrb.mxu0 %v3425_v14 }
 0x1cf   :  { %2435 = vmatmul.bf16.vlgmr.msra.gmra.mxu3 %v4973_v15  ;;  %v3967_v15 = vld [vmem:[%s5988_s5 + $0x5a8] sm:$0xf0] }
 0x1d0   :  { %2457 = vmatpush.bf16.msrb.mxu1 %v3593_v27  ;;  %v3537_v46 = vor.u32 %v3967_v15, %v3536_v39  ;;  %v2165_v54 = vpop.f32.mrf.mxu2 }
 0x1d2   :  { %2421 = vmatpush.bf16.msra.mxu2 %v2837_v28  ;;  %2443 = vmatpush.bf16.msrb.mxu0 %v3397_v31  ;;  %v2189_v59 = vpop.f32.mrf.mxu0  ;;  %v2228_v60 = vpop.f32.mrf.mxu3 }
 0x1d3   :  { %v2190_v61 = vadd.f32 %v2189_v59, %v2177_v56  ;;  %v942_v56 = vperm.slane %v5856_v43, 6 }
 0x1d4   :  { %2458 = vmatpush.bf16.msrb.mxu1 %v3565_v36  ;;  %v2204_v63 = vpop.f32.mrf.mxu1 }
 0x1d5   :  { %2422 = vmatmul.bf16.vlgmr.msra.gmra.mxu2 %v4995_v30  ;;  %v3312_v30 = vld [vmem:[%s5988_s5 + $0x3d0] sm:$0xf]  ;;  %v2203_v1 = vadd.f32 %v2202_v47, %v2190_v61  ;;  %s4037_s5 = smov [#allocation2]  }
 0x1d6   :  { %2444 = vmatpush.bf16.msrb.mxu0 %v3369_v38  ;;  %v3313_v55 = vor.u32 %v3911_v52, %v3312_v30  ;;  %s2479_s17 = sshll.u32 %s4037_s5, 4  ;;  %s2480_s17 = int_to_ptr.vmem [resolvable:$true] %s2479_s17 }
 0x1d7   :  { %2467 = vst [vmem:[#allocation2 + $0x8] sm:$0xff] %v2203_v1 }
 0x1d8   :  { %2459 = vmatpush.bf16.msrb.mxu1 %v3537_v46  ;;  %v2215_v2 = vpop.f32.mrf.mxu2 }
 0x1d9   :  { %v2216_v7 = vadd.f32 %v2215_v2, %v938_v4 }
 0x1da   :  { %2445 = vmatpush.bf16.msrb.mxu0 %v3341_v48  ;;  %v2191_v5 = vpop.f32.mrf.mxu0  ;;  %v2230_v3 = vpop.f32.mrf.mxu3 }
 0x1db   :  { %v2229_v9 = vadd.f32 %v2228_v60, %v2216_v7 }
 0x1dc   :  { %2460 = vmatpush.bf16.msrb.mxu1 %v3509_v53  ;;  %v2254_v6 = vpop.f32.mrf.mxu1 }
 0x1de   :  { %2446 = vmatpush.bf16.msrb.mxu0 %v3313_v55 }
 0x1df   :  { %2461 = vmatmul.bf16.vlgmr.msrb.gmra.mxu1 %v5038_v62 }
 0x1e0   :  { %v2217_v8 = vpop.f32.mrf.mxu2 }
 0x1e2   :  { %2447 = vmatpush.bf16.msrb.mxu0 %v3285_v0  ;;  %v2241_v10 = vpop.f32.mrf.mxu0 }
 0x1e3   :  { %v2242_v11 = vadd.f32 %v2241_v10, %v2229_v9 }
 0x1e4   :  { %v2256_v12 = vpop.f32.mrf.mxu1 }
 0x1e5   :  { %2448 = vmatmul.bf16.vlgmr.msrb.gmra.mxu0 %v5078_v22  ;;  %v2255_v13 = vadd.f32 %v2254_v6, %v2242_v11 }
 0x1e7   :  { %2468 = vst [vmem:[#allocation2 + $0x10] sm:$0xff] %v2255_v13 }
 0x1ea   :  { %v2243_v14 = vpop.f32.mrf.mxu0 }
 0x1f2   :  { %v2280_v62 = vpop.f32.mrf.mxu3 }
 0x1f8   :  { %v2267_v16 = vpop.f32.mrf.mxu2 }
 0x1f9   :  { %v2268_v20 = vadd.f32 %v2267_v16, %v939_v17 }
 0x1fa   :  { %v2282_v18 = vpop.f32.mrf.mxu3 }
 0x1fb   :  { %v2281_v23 = vadd.f32 %v2280_v62, %v2268_v20 }
 0x1fc   :  { %v2306_v19 = vpop.f32.mrf.mxu1 }
 0x200   :  { %v2269_v21 = vpop.f32.mrf.mxu2 }
 0x202   :  { %v2293_v22 = vpop.f32.mrf.mxu0 }
 0x203   :  { %v2294_v24 = vadd.f32 %v2293_v22, %v2281_v23 }
 0x204   :  { %v2308_v26 = vpop.f32.mrf.mxu1 }
 0x205   :  { %v2307_v27 = vadd.f32 %v2306_v19, %v2294_v24 }
 0x207   :  { %2469 = vst [vmem:[#allocation2 + $0x18] sm:$0xff] %v2307_v27 }
 0x20a   :  { %v2295_v28 = vpop.f32.mrf.mxu0 }
 0x212   :  { %v2332_v29 = vpop.f32.mrf.mxu3 }
 0x218   :  { %v2319_v31 = vpop.f32.mrf.mxu2 }
 0x219   :  { %v2320_v34 = vadd.f32 %v2319_v31, %v940_v25 }
 0x21a   :  { %v2334_v32 = vpop.f32.mrf.mxu3 }
 0x21b   :  { %v2333_v36 = vadd.f32 %v2332_v29, %v2320_v34 }
 0x21c   :  { %v2358_v33 = vpop.f32.mrf.mxu1 }
 0x220   :  { %v2321_v35 = vpop.f32.mrf.mxu2 }
 0x222   :  { %v2345_v37 = vpop.f32.mrf.mxu0 }
 0x223   :  { %v2346_v38 = vadd.f32 %v2345_v37, %v2333_v36 }
 0x224   :  { %v2360_v39 = vpop.f32.mrf.mxu1 }
 0x225   :  { %v2359_v15 = vadd.f32 %v2358_v33, %v2346_v38 }
 0x227   :  { %2470 = vst [vmem:[#allocation2 + $0x20] sm:$0xff] %v2359_v15 }
 0x22a   :  { %v2347_v40 = vpop.f32.mrf.mxu0 }
 0x232   :  { %v2384_v41 = vpop.f32.mrf.mxu3 }
 0x238   :  { %v2371_v42 = vpop.f32.mrf.mxu2 }
 0x239   :  { %v2372_v47 = vadd.f32 %v2371_v42, %v941_v44 }
 0x23a   :  { %v2386_v45 = vpop.f32.mrf.mxu3 }
 0x23b   :  { %v2385_v49 = vadd.f32 %v2384_v41, %v2372_v47 }
 0x23c   :  { %v2410_v46 = vpop.f32.mrf.mxu1 }
 0x240   :  { %v2373_v48 = vpop.f32.mrf.mxu2 }
 0x242   :  { %v2397_v50 = vpop.f32.mrf.mxu0 }
 0x243   :  { %v2398_v51 = vadd.f32 %v2397_v50, %v2385_v49 }
 0x244   :  { %v2412_v30 = vpop.f32.mrf.mxu1 }
 0x245   :  { %v2411_v52 = vadd.f32 %v2410_v46, %v2398_v51 }
 0x247   :  { %2471 = vst [vmem:[#allocation2 + $0x28] sm:$0xff] %v2411_v52 }
 0x24a   :  { %v2399_v53 = vpop.f32.mrf.mxu0 }
 0x252   :  { %v2436_v54 = vpop.f32.mrf.mxu3 }
 0x258   :  { %v2423_v55 = vpop.f32.mrf.mxu2 }
 0x259   :  { %v2424_v58 = vadd.f32 %v2423_v55, %v942_v56 }
 0x25a   :  { %v2438_v57 = vpop.f32.mrf.mxu3 }
 0x25b   :  { %v2437_v61 = vadd.f32 %v2436_v54, %v2424_v58 }
 0x25c   :  { %v2462_v59 = vpop.f32.mrf.mxu1 }
 0x260   :  { %v2425_v60 = vpop.f32.mrf.mxu2 }
 0x262   :  { %v2449_v63 = vpop.f32.mrf.mxu0 }
 0x263   :  { %v2450_v0 = vadd.f32 %v2449_v63, %v2437_v61 }
 0x264   :  { %v2464_v2 = vpop.f32.mrf.mxu1 }
 0x265   :  { %v2463_v1 = vadd.f32 %v2462_v59, %v2450_v0 }
 0x267   :  { %2473 = vst.msk [vmem:[#allocation2 + $0x30] sm:$0xff] %vm2472_vm6, %v2463_v1 }
 0x268   :  { %2484 = dma.vmem_to_hbm [thread:$0]  %s2480_s17, 896, %s2482_s20, [#allocation3]  }
 0x26a   :  { %v2451_v43 = vpop.f32.mrf.mxu0 }
 0x26b   :  { %4035 = dma.done.wait [#allocation3], 896  }
 0x26c   :  { %4036 = vsyncadd [#allocation3], 4294966400 }
 0x26d   :  { %2489 = vsyncpa [#allocation3], 1 }

</bundles_post_ra>
